<compile_context>
chip_gen: v6e
topology: v6e:2x2x1
jax: 0.10.0
libtpu: 0.0.40
codegen_flags: <defaults>
</compile_context>

<pallas_src>
import math

import jax
import jax.numpy as jnp
from jax.experimental import pallas as pl
from jax.experimental.pallas import tpu as pltpu


# ----------------------------- shared LSTM cell math -----------------------------

def _lstm_cell(gates_in, h_prev, c_prev, whh):
    """One LSTM cell update for one direction.

    gates_in: (B, 4H) f32  precomputed x@W_ih + b_ih + b_hh (gate order i,f,g,o)
    h_prev:   (B, H)  f32  previous hidden state
    c_prev:   (B, H)  f32  previous cell state
    whh:      (H, 4H) bf16 recurrent weights (transposed)
    """
    H = h_prev.shape[-1]
    gates = gates_in + jnp.dot(h_prev.astype(jnp.bfloat16), whh,
                               preferred_element_type=jnp.float32)
    i_g = jax.nn.sigmoid(gates[:, 0 * H:1 * H])
    f_g = jax.nn.sigmoid(gates[:, 1 * H:2 * H])
    g_g = jnp.tanh(gates[:, 2 * H:3 * H])
    o_g = jax.nn.sigmoid(gates[:, 3 * H:4 * H])
    c_new = f_g * c_prev + i_g * g_g
    h_new = o_g * jnp.tanh(c_new)
    return h_new, c_new


# ----------------------------- recurrent layer kernels -----------------------------

def _bilstm_layer_kernel(gf_ref, gb_ref, whh_ref, of_ref, ob_ref, h_scr, c_scr):
    """One grid step = one timestep, both directions fused.

    gf_ref: (1, B, 4H) f32  fwd precomputed input gates at time t
    gb_ref: (1, B, 4H) f32  bwd precomputed input gates at time T-1-t
    whh_ref:(2, H, 4H) bf16 stacked recurrent weights [fwd, bwd]
    of_ref: (1, B, H)  bf16 fwd hidden out at time t
    ob_ref: (1, B, H)  bf16 bwd hidden out at time T-1-t
    h_scr/c_scr: (2, B, H) f32 recurrent state for both directions.
    """
    t = pl.program_id(0)

    @pl.when(t == 0)
    def _():
        h_scr[...] = jnp.zeros_like(h_scr)
        c_scr[...] = jnp.zeros_like(c_scr)

    hf, cf = _lstm_cell(gf_ref[0], h_scr[0], c_scr[0], whh_ref[0])
    hb, cb = _lstm_cell(gb_ref[0], h_scr[1], c_scr[1], whh_ref[1])

    h_scr[0] = hf
    c_scr[0] = cf
    h_scr[1] = hb
    c_scr[1] = cb
    of_ref[0] = hf.astype(of_ref.dtype)
    ob_ref[0] = hb.astype(ob_ref.dtype)


def _bilstm_last_layer_kernel(gf_ref, gb_ref, whh_ref, wfc_ref, bfc_ref,
                              out_ref, h_scr, c_scr):
    """Last bidirectional layer fused with the FC head; emits only logits.

    wfc_ref: (2, H, O) f32  fc weight split [from fwd hidden, from bwd hidden]
    bfc_ref: (1, O)    f32
    out_ref: (B, O)    f32  logits (constant block index across the time grid)
    """
    t = pl.program_id(0)

    @pl.when(t == 0)
    def _():
        h_scr[...] = jnp.zeros_like(h_scr)
        c_scr[...] = jnp.zeros_like(c_scr)

    hf, cf = _lstm_cell(gf_ref[0], h_scr[0], c_scr[0], whh_ref[0])
    hb, cb = _lstm_cell(gb_ref[0], h_scr[1], c_scr[1], whh_ref[1])

    h_scr[0] = hf
    c_scr[0] = cf
    h_scr[1] = hb
    c_scr[1] = cb

    # Backward direction's hidden at sequence position T-1 is produced at step 0.
    @pl.when(t == 0)
    def _():
        out_ref[...] = bfc_ref[...] + jnp.dot(
            hb, wfc_ref[1], preferred_element_type=jnp.float32)

    # Forward direction's hidden at sequence position T-1 is produced last.
    @pl.when(t == pl.num_programs(0) - 1)
    def _():
        out_ref[...] = out_ref[...] + jnp.dot(
            hf, wfc_ref[0], preferred_element_type=jnp.float32)


def bilstm_layer(gates, whh, *, last_layer, wfc=None, bfc=None):
    """Run one fused bidirectional LSTM layer.

    gates: (T, B, 8H) f32   [fwd gates | bwd gates] per timestep (bias folded in)
    whh:   (2, H, 4H) bf16
    If last_layer: also needs wfc (2, H, O) and bfc (1, O); returns (B, O) logits.
    Else: returns (out_fwd, out_bwd), each (T, B, H) bf16.
    """
    T, B, G8 = gates.shape
    H = G8 // 8

    # The same `gates` array is passed twice with different index_maps:
    # fwd reads block (t, 0, col-block 0), bwd reads block (T-1-t, 0, col-block 1).
    gf_spec = pl.BlockSpec((1, B, 4 * H), lambda t: (t, 0, 0))
    gb_spec = pl.BlockSpec((1, B, 4 * H), lambda t: (T - 1 - t, 0, 1))
    whh_spec = pl.BlockSpec((2, H, 4 * H), lambda t: (0, 0, 0))
    scratch = [pltpu.VMEM((2, B, H), jnp.float32),
               pltpu.VMEM((2, B, H), jnp.float32)]
    cparams = pltpu.CompilerParams(dimension_semantics=("arbitrary",))

    if not last_layer:
        return pl.pallas_call(
            _bilstm_layer_kernel,
            out_shape=(jax.ShapeDtypeStruct((T, B, H), jnp.bfloat16),
                       jax.ShapeDtypeStruct((T, B, H), jnp.bfloat16)),
            grid_spec=pltpu.PrefetchScalarGridSpec(
                num_scalar_prefetch=0,
                grid=(T,),
                in_specs=[gf_spec, gb_spec, whh_spec],
                out_specs=[pl.BlockSpec((1, B, H), lambda t: (t, 0, 0)),
                           pl.BlockSpec((1, B, H), lambda t: (T - 1 - t, 0, 0))],
                scratch_shapes=scratch),
            compiler_params=cparams,
        )(gates, gates, whh)

    O = wfc.shape[-1]
    return pl.pallas_call(
        _bilstm_last_layer_kernel,
        out_shape=jax.ShapeDtypeStruct((B, O), jnp.float32),
        grid_spec=pltpu.PrefetchScalarGridSpec(
            num_scalar_prefetch=0,
            grid=(T,),
            in_specs=[gf_spec, gb_spec, whh_spec,
                      pl.BlockSpec((2, H, O), lambda t: (0, 0, 0)),
                      pl.BlockSpec((1, O), lambda t: (0, 0))],
            out_specs=pl.BlockSpec((B, O), lambda t: (0, 0)),
            scratch_shapes=scratch),
        compiler_params=cparams,
    )(gates, gates, whh, wfc, bfc)


# ----------------------------- input-projection kernels -----------------------------

def _proj1_kernel(x_ref, w_ref, b_ref, o_ref):
    o_ref[...] = (jnp.dot(x_ref[...], w_ref[...],
                          preferred_element_type=jnp.float32) + b_ref[...])


def _proj2_kernel(xf_ref, xb_ref, wf_ref, wb_ref, b_ref, o_ref):
    o_ref[...] = (jnp.dot(xf_ref[...], wf_ref[...],
                          preferred_element_type=jnp.float32)
                  + jnp.dot(xb_ref[...], wb_ref[...],
                            preferred_element_type=jnp.float32)
                  + b_ref[...])


def proj_single(x_flat, w, b):
    """x_flat: (M, Din) bf16, w: (Din, 8H) bf16, b: (1, 8H) f32 -> (M, 8H) f32."""
    M, Din = x_flat.shape
    N = w.shape[1]
    return pl.pallas_call(
        _proj1_kernel,
        out_shape=jax.ShapeDtypeStruct((M, N), jnp.float32),
        grid=(1,),
        in_specs=[pl.BlockSpec((M, Din), lambda i: (0, 0)),
                  pl.BlockSpec((Din, N), lambda i: (0, 0)),
                  pl.BlockSpec((1, N), lambda i: (0, 0))],
        out_specs=pl.BlockSpec((M, N), lambda i: (0, 0)),
    )(x_flat, w, b)


def proj_pair(xf_flat, xb_flat, wf, wb, b):
    """Two-operand projection (consumes prev-layer fwd/bwd halves, no concat)."""
    M, H = xf_flat.shape
    N = wf.shape[1]
    return pl.pallas_call(
        _proj2_kernel,
        out_shape=jax.ShapeDtypeStruct((M, N), jnp.float32),
        grid=(1,),
        in_specs=[pl.BlockSpec((M, H), lambda i: (0, 0)),
                  pl.BlockSpec((M, H), lambda i: (0, 0)),
                  pl.BlockSpec((H, N), lambda i: (0, 0)),
                  pl.BlockSpec((H, N), lambda i: (0, 0)),
                  pl.BlockSpec((1, N), lambda i: (0, 0))],
        out_specs=pl.BlockSpec((M, N), lambda i: (0, 0)),
    )(xf_flat, xb_flat, wf, wb, b)


# ----------------------------- parameter init & packing -----------------------------

def xavier_uniform(key, shape):
    # PyTorch xavier_uniform_ on a 2-D (out, in) weight.
    fan_out, fan_in = shape
    bound = math.sqrt(6.0 / (fan_in + fan_out))
    return jax.random.uniform(key, shape, jnp.float32, -bound, bound)


def init_bilstm_params(key, input_size, hidden_size, num_layers, output_size):
    """Raw parameters in PyTorch layout (gate order i,f,g,o; zero biases)."""
    params = {"layers": []}
    keys = jax.random.split(key, num_layers * 2 * 2 + 1)
    ki = 0
    for layer in range(num_layers):
        d_in = input_size if layer == 0 else 2 * hidden_size
        layer_p = {}
        for direction in ("fwd", "bwd"):
            w_ih = xavier_uniform(keys[ki], (4 * hidden_size, d_in)); ki += 1
            w_hh = xavier_uniform(keys[ki], (4 * hidden_size, hidden_size)); ki += 1
            b_ih = jnp.zeros((4 * hidden_size,), jnp.float32)
            b_hh = jnp.zeros((4 * hidden_size,), jnp.float32)
            layer_p[direction] = (w_ih, w_hh, b_ih, b_hh)
        params["layers"].append(layer_p)
    params["fc_w"] = xavier_uniform(keys[ki], (output_size, 2 * hidden_size))
    params["fc_b"] = jnp.zeros((output_size,), jnp.float32)
    return params


def pack_params(raw, hidden_size):
    """Pre-transpose / pre-pack weights once (bf16 for MXU operands)."""
    H = hidden_size
    packed = {"layers": []}
    for layer, lp in enumerate(raw["layers"]):
        w_ih_f, w_hh_f, b_ih_f, b_hh_f = lp["fwd"]
        w_ih_b, w_hh_b, b_ih_b, b_hh_b = lp["bwd"]
        entry = {
            "bias": jnp.concatenate([b_ih_f + b_hh_f,
                                     b_ih_b + b_hh_b]).reshape(1, 8 * H),
            "whh": jnp.stack([w_hh_f.T, w_hh_b.T]).astype(jnp.bfloat16),  # (2,H,4H)
        }
        if layer == 0:
            entry["wih"] = jnp.concatenate(
                [w_ih_f.T, w_ih_b.T], axis=1).astype(jnp.bfloat16)        # (Din,8H)
        else:
            # Upper-layer input is [h_fwd | h_bwd]; keep the two halves separate.
            entry["wih_f"] = jnp.concatenate(
                [w_ih_f[:, :H].T, w_ih_b[:, :H].T], axis=1).astype(jnp.bfloat16)
            entry["wih_b"] = jnp.concatenate(
                [w_ih_f[:, H:].T, w_ih_b[:, H:].T], axis=1).astype(jnp.bfloat16)
        packed["layers"].append(entry)
    fc_w, fc_b = raw["fc_w"], raw["fc_b"]                 # (O, 2H), (O,)
    packed["fc_w"] = jnp.stack([fc_w[:, :H].T, fc_w[:, H:].T])  # (2, H, O) f32
    packed["fc_b"] = fc_b.reshape(1, -1)
    return packed


# ----------------------------- forward pass -----------------------------

@jax.jit
def bilstm_net_forward(packed, x):
    """x: (B, T, input_size) float32 -> (B, output_size) float32."""
    B, T, Din = x.shape
    H = packed["layers"][0]["whh"].shape[1]
    num_layers = len(packed["layers"])

    # Pad batch to a multiple of 8 sublanes (f32); padded rows are discarded.
    Bp = -(-B // 8) * 8
    xt = jnp.transpose(x, (1, 0, 2))                     # time-major (T, B, Din)
    if Bp != B:
        xt = jnp.pad(xt, ((0, 0), (0, Bp - B), (0, 0)))
    x_flat = xt.reshape(T * Bp, Din).astype(jnp.bfloat16)

    out_f = out_b = None
    logits = None
    for layer, lp in enumerate(packed["layers"]):
        # Hoisted input projection: one big matmul over all T*Bp rows,
        # both directions at once (columns [0:4H]=fwd, [4H:8H]=bwd), bias folded.
        if layer == 0:
            gates = proj_single(x_flat, lp["wih"], lp["bias"])
        else:
            gates = proj_pair(out_f.reshape(T * Bp, H), out_b.reshape(T * Bp, H),
                              lp["wih_f"], lp["wih_b"], lp["bias"])
        gates = gates.reshape(T, Bp, 8 * H)

        if layer < num_layers - 1:
            out_f, out_b = bilstm_layer(gates, lp["whh"], last_layer=False)
        else:
            # TODO(synk): dropout is identity here (eval mode); training-mode
            # Bernoulli masking + 1/(1-p) scaling is not implemented.
            logits = bilstm_layer(gates, lp["whh"], last_layer=True,
                                  wfc=packed["fc_w"], bfc=packed["fc_b"])

    return logits[:B]


# ----------------------------- pure-JAX reference (same numerics) -----------------------------

def _ref_lstm_dir(gates, whh):
    """gates: (T, B, 4H) f32, whh: (H, 4H) bf16 -> (T, B, H) f32 hidden sequence."""
    T, B, G = gates.shape
    H = G // 4

    def step(carry, g):
        h, c = carry
        gg = g + jnp.dot(h.astype(jnp.bfloat16), whh,
                         preferred_element_type=jnp.float32)
        i = jax.nn.sigmoid(gg[:, :H])
        f = jax.nn.sigmoid(gg[:, H:2 * H])
        gt = jnp.tanh(gg[:, 2 * H:3 * H])
        o = jax.nn.sigmoid(gg[:, 3 * H:])
        c = f * c + i * gt
        h = o * jnp.tanh(c)
        return (h, c), h

    init = (jnp.zeros((B, H), jnp.float32), jnp.zeros((B, H), jnp.float32))
    _, hs = jax.lax.scan(step, init, gates)
    return hs


def reference_forward(packed, x):
    B, T, Din = x.shape
    H = packed["layers"][0]["whh"].shape[1]
    xt = jnp.transpose(x, (1, 0, 2)).astype(jnp.bfloat16)     # (T, B, Din)
    h_f = h_b = None
    for layer, lp in enumerate(packed["layers"]):
        if layer == 0:
            gates = (jnp.dot(xt.reshape(T * B, Din), lp["wih"],
                             preferred_element_type=jnp.float32) + lp["bias"])
        else:
            gates = (jnp.dot(h_f.reshape(T * B, H).astype(jnp.bfloat16), lp["wih_f"],
                             preferred_element_type=jnp.float32)
                     + jnp.dot(h_b.reshape(T * B, H).astype(jnp.bfloat16), lp["wih_b"],
                               preferred_element_type=jnp.float32)
                     + lp["bias"])
        gates = gates.reshape(T, B, 8 * H)
        h_f = _ref_lstm_dir(gates[:, :, :4 * H], lp["whh"][0])
        h_b = _ref_lstm_dir(gates[::-1, :, 4 * H:], lp["whh"][1])[::-1]
    wfc = packed["fc_w"]
    return (packed["fc_b"]
            + jnp.dot(h_f[-1], wfc[0], preferred_element_type=jnp.float32)
            + jnp.dot(h_b[-1], wfc[1], preferred_element_type=jnp.float32))


# ----------------------------- main -----------------------------

if __name__ == "__main__":
    B, T = 2, 8
    input_size, hidden_size, num_layers, output_size, dropout = 16, 32, 2, 4, 0.5

    key = jax.random.PRNGKey(0)
    pkey, xkey = jax.random.split(key)
    raw_params = init_bilstm_params(pkey, input_size, hidden_size,
                                    num_layers, output_size)
    packed = pack_params(raw_params, hidden_size)
    x = jax.random.normal(xkey, (B, T, input_size), jnp.float32)

    out = bilstm_net_forward(packed, x)
    jax.block_until_ready(out)
    assert out.shape == (B, output_size)

    ref = reference_forward(packed, x)
    max_err = float(jnp.max(jnp.abs(out - ref)))
    assert max_err < 1e-2, f"mismatch vs reference: {max_err}"

    print("KERNEL_OK")
</pallas_src>

<mosaic_0001>
module attributes {stable_mosaic.version = 11 : i64} {
  func.func @_proj1_kernel(%arg0: i32, %arg1: memref<64x16xbf16, #tpu.memory_space<vmem>>, %arg2: memref<16x256xbf16, #tpu.memory_space<vmem>>, %arg3: memref<1x256xf32, #tpu.memory_space<vmem>>, %arg4: memref<64x256xf32, #tpu.memory_space<vmem>>) attributes {dimension_semantics = [#tpu.dimension_semantics<arbitrary>], iteration_bounds = array<i64: 1>, scalar_prefetch = 0 : i64, scratch_operands = 0 : i64, tpu.core_type = #tpu.core_type<tc>, window_params = [{pipeline_mode = #tpu.pipeline_mode<synchronous>, transform_indices = @transform_0, window_bounds = array<i64: 64, 16>}, {pipeline_mode = #tpu.pipeline_mode<synchronous>, transform_indices = @transform_1, window_bounds = array<i64: 16, 256>}, {pipeline_mode = #tpu.pipeline_mode<synchronous>, transform_indices = @transform_2, window_bounds = array<i64: 1, 256>}, {pipeline_mode = #tpu.pipeline_mode<synchronous>, transform_indices = @transform_3, window_bounds = array<i64: 64, 256>}]} {
    %c0 = arith.constant 0 : index
    %c0_0 = arith.constant 0 : index
    %0 = vector.load %arg1[%c0, %c0_0] : memref<64x16xbf16, #tpu.memory_space<vmem>>, vector<64x16xbf16>
    %c0_1 = arith.constant 0 : index
    %c0_2 = arith.constant 0 : index
    %1 = vector.load %arg2[%c0_1, %c0_2] : memref<16x256xbf16, #tpu.memory_space<vmem>>, vector<16x256xbf16>
    %cst = arith.constant dense<0.000000e+00> : vector<64x256xf32>
    %2 = tpu.matmul %0, %1, %cst {dimension_numbers = #tpu.dot_dimension_numbers<[1], [0], [0], [1], [0, 0, 1, 1], [], []>} : vector<64x16xbf16>, vector<16x256xbf16>, vector<64x256xf32> -> vector<64x256xf32>
    %c0_3 = arith.constant 0 : index
    %c0_4 = arith.constant 0 : index
    %3 = vector.load %arg3[%c0_3, %c0_4] : memref<1x256xf32, #tpu.memory_space<vmem>>, vector<1x256xf32>
    %4 = vector.broadcast %3 : vector<1x256xf32> to vector<64x256xf32>
    %5 = arith.addf %2, %4 : vector<64x256xf32>
    %c0_5 = arith.constant 0 : index
    %c0_6 = arith.constant 0 : index
    %6 = vector.load %arg4[%c0_5, %c0_6] : memref<64x256xf32, #tpu.memory_space<vmem>>, vector<64x256xf32>
    tpu.vector_store %arg4[%c0_5, %c0_6], %5 {strides = array<i32>} : memref<64x256xf32, #tpu.memory_space<vmem>>, vector<64x256xf32>,
    return
  }
  func.func @transform_0(%arg0: i32) -> (i32, i32) {
    %c0_i32 = arith.constant 0 : i32
    %c0_i32_0 = arith.constant 0 : i32
    %c0_i32_1 = arith.constant 0 : i32
    return %c0_i32, %c0_i32_0 : i32, i32
  }
  func.func @transform_1(%arg0: i32) -> (i32, i32) {
    %c0_i32 = arith.constant 0 : i32
    %c0_i32_0 = arith.constant 0 : i32
    %c0_i32_1 = arith.constant 0 : i32
    return %c0_i32, %c0_i32_0 : i32, i32
  }
  func.func @transform_2(%arg0: i32) -> (i32, i32) {
    %c0_i32 = arith.constant 0 : i32
    %c0_i32_0 = arith.constant 0 : i32
    %c0_i32_1 = arith.constant 0 : i32
    return %c0_i32, %c0_i32_0 : i32, i32
  }
  func.func @transform_3(%arg0: i32) -> (i32, i32) {
    %c0_i32 = arith.constant 0 : i32
    %c0_i32_0 = arith.constant 0 : i32
    %c0_i32_1 = arith.constant 0 : i32
    return %c0_i32, %c0_i32_0 : i32, i32
  }
}

module attributes {stable_mosaic.version = 11 : i64} {
  func.func @_proj2_kernel(%arg0: i32, %arg1: memref<64x32xbf16, #tpu.memory_space<vmem>>, %arg2: memref<64x32xbf16, #tpu.memory_space<vmem>>, %arg3: memref<32x256xbf16, #tpu.memory_space<vmem>>, %arg4: memref<32x256xbf16, #tpu.memory_space<vmem>>, %arg5: memref<1x256xf32, #tpu.memory_space<vmem>>, %arg6: memref<64x256xf32, #tpu.memory_space<vmem>>) attributes {dimension_semantics = [#tpu.dimension_semantics<arbitrary>], iteration_bounds = array<i64: 1>, scalar_prefetch = 0 : i64, scratch_operands = 0 : i64, tpu.core_type = #tpu.core_type<tc>, window_params = [{pipeline_mode = #tpu.pipeline_mode<synchronous>, transform_indices = @transform_0, window_bounds = array<i64: 64, 32>}, {pipeline_mode = #tpu.pipeline_mode<synchronous>, transform_indices = @transform_1, window_bounds = array<i64: 64, 32>}, {pipeline_mode = #tpu.pipeline_mode<synchronous>, transform_indices = @transform_2, window_bounds = array<i64: 32, 256>}, {pipeline_mode = #tpu.pipeline_mode<synchronous>, transform_indices = @transform_3, window_bounds = array<i64: 32, 256>}, {pipeline_mode = #tpu.pipeline_mode<synchronous>, transform_indices = @transform_4, window_bounds = array<i64: 1, 256>}, {pipeline_mode = #tpu.pipeline_mode<synchronous>, transform_indices = @transform_5, window_bounds = array<i64: 64, 256>}]} {
    %c0 = arith.constant 0 : index
    %c0_0 = arith.constant 0 : index
    %0 = vector.load %arg1[%c0, %c0_0] : memref<64x32xbf16, #tpu.memory_space<vmem>>, vector<64x32xbf16>
    %c0_1 = arith.constant 0 : index
    %c0_2 = arith.constant 0 : index
    %1 = vector.load %arg3[%c0_1, %c0_2] : memref<32x256xbf16, #tpu.memory_space<vmem>>, vector<32x256xbf16>
    %cst = arith.constant dense<0.000000e+00> : vector<64x256xf32>
    %2 = tpu.matmul %0, %1, %cst {dimension_numbers = #tpu.dot_dimension_numbers<[1], [0], [0], [1], [0, 0, 1, 1], [], []>} : vector<64x32xbf16>, vector<32x256xbf16>, vector<64x256xf32> -> vector<64x256xf32>
    %c0_3 = arith.constant 0 : index
    %c0_4 = arith.constant 0 : index
    %3 = vector.load %arg2[%c0_3, %c0_4] : memref<64x32xbf16, #tpu.memory_space<vmem>>, vector<64x32xbf16>
    %c0_5 = arith.constant 0 : index
    %c0_6 = arith.constant 0 : index
    %4 = vector.load %arg4[%c0_5, %c0_6] : memref<32x256xbf16, #tpu.memory_space<vmem>>, vector<32x256xbf16>
    %cst_7 = arith.constant dense<0.000000e+00> : vector<64x256xf32>
    %5 = tpu.matmul %3, %4, %cst_7 {dimension_numbers = #tpu.dot_dimension_numbers<[1], [0], [0], [1], [0, 0, 1, 1], [], []>} : vector<64x32xbf16>, vector<32x256xbf16>, vector<64x256xf32> -> vector<64x256xf32>
    %6 = arith.addf %2, %5 : vector<64x256xf32>
    %c0_8 = arith.constant 0 : index
    %c0_9 = arith.constant 0 : index
    %7 = vector.load %arg5[%c0_8, %c0_9] : memref<1x256xf32, #tpu.memory_space<vmem>>, vector<1x256xf32>
    %8 = vector.broadcast %7 : vector<1x256xf32> to vector<64x256xf32>
    %9 = arith.addf %6, %8 : vector<64x256xf32>
    %c0_10 = arith.constant 0 : index
    %c0_11 = arith.constant 0 : index
    %10 = vector.load %arg6[%c0_10, %c0_11] : memref<64x256xf32, #tpu.memory_space<vmem>>, vector<64x256xf32>
    tpu.vector_store %arg6[%c0_10, %c0_11], %9 {strides = array<i32>} : memref<64x256xf32, #tpu.memory_space<vmem>>, vector<64x256xf32>,
    return
  }
  func.func @transform_0(%arg0: i32) -> (i32, i32) {
    %c0_i32 = arith.constant 0 : i32
    %c0_i32_0 = arith.constant 0 : i32
    %c0_i32_1 = arith.constant 0 : i32
    return %c0_i32, %c0_i32_0 : i32, i32
  }
  func.func @transform_1(%arg0: i32) -> (i32, i32) {
    %c0_i32 = arith.constant 0 : i32
    %c0_i32_0 = arith.constant 0 : i32
    %c0_i32_1 = arith.constant 0 : i32
    return %c0_i32, %c0_i32_0 : i32, i32
  }
  func.func @transform_2(%arg0: i32) -> (i32, i32) {
    %c0_i32 = arith.constant 0 : i32
    %c0_i32_0 = arith.constant 0 : i32
    %c0_i32_1 = arith.constant 0 : i32
    return %c0_i32, %c0_i32_0 : i32, i32
  }
  func.func @transform_3(%arg0: i32) -> (i32, i32) {
    %c0_i32 = arith.constant 0 : i32
    %c0_i32_0 = arith.constant 0 : i32
    %c0_i32_1 = arith.constant 0 : i32
    return %c0_i32, %c0_i32_0 : i32, i32
  }
  func.func @transform_4(%arg0: i32) -> (i32, i32) {
    %c0_i32 = arith.constant 0 : i32
    %c0_i32_0 = arith.constant 0 : i32
    %c0_i32_1 = arith.constant 0 : i32
    return %c0_i32, %c0_i32_0 : i32, i32
  }
  func.func @transform_5(%arg0: i32) -> (i32, i32) {
    %c0_i32 = arith.constant 0 : i32
    %c0_i32_0 = arith.constant 0 : i32
    %c0_i32_1 = arith.constant 0 : i32
    return %c0_i32, %c0_i32_0 : i32, i32
  }
}

module attributes {stable_mosaic.version = 11 : i64} {
  func.func @_bilstm_layer_kernel(%arg0: i32, %arg1: memref<1x8x128xf32, #tpu.memory_space<vmem>>, %arg2: memref<1x8x128xf32, #tpu.memory_space<vmem>>, %arg3: memref<2x32x128xbf16, #tpu.memory_space<vmem>>, %arg4: memref<1x8x32xbf16, #tpu.memory_space<vmem>>, %arg5: memref<1x8x32xbf16, #tpu.memory_space<vmem>>, %arg6: memref<2x8x32xf32, #tpu.memory_space<vmem>>, %arg7: memref<2x8x32xf32, #tpu.memory_space<vmem>>) attributes {dimension_semantics = [#tpu.dimension_semantics<arbitrary>], iteration_bounds = array<i64: 8>, scalar_prefetch = 0 : i64, scratch_operands = 2 : i64, tpu.core_type = #tpu.core_type<tc>, window_params = [{transform_indices = @transform_0, window_bounds = array<i64: 1, 8, 128>}, {transform_indices = @transform_1, window_bounds = array<i64: 1, 8, 128>}, {pipeline_mode = #tpu.pipeline_mode<synchronous>, transform_indices = @transform_2, window_bounds = array<i64: 2, 32, 128>}, {transform_indices = @transform_3, window_bounds = array<i64: 1, 8, 32>}, {transform_indices = @transform_4, window_bounds = array<i64: 1, 8, 32>}]} {
    %c0_i32 = arith.constant 0 : i32
    %0 = arith.cmpi eq, %arg0, %c0_i32 : i32
    %1 = arith.extui %0 : i1 to i32
    %c0_i32_0 = arith.constant 0 : i32
    %2 = arith.cmpi ne, %1, %c0_i32_0 : i32
    scf.if %2 {
      %cst_48 = arith.constant 0.000000e+00 : f32
      %95 = vector.broadcast %cst_48 : f32 to vector<2x8x32xf32>
      %c0_49 = arith.constant 0 : index
      %c0_50 = arith.constant 0 : index
      %c0_51 = arith.constant 0 : index
      %96 = vector.load %arg6[%c0_49, %c0_50, %c0_51] : memref<2x8x32xf32, #tpu.memory_space<vmem>>, vector<2x8x32xf32>
      tpu.vector_store %arg6[%c0_49, %c0_50, %c0_51], %95 {strides = array<i32>} : memref<2x8x32xf32, #tpu.memory_space<vmem>>, vector<2x8x32xf32>,
      %cst_52 = arith.constant 0.000000e+00 : f32
      %97 = vector.broadcast %cst_52 : f32 to vector<2x8x32xf32>
      %c0_53 = arith.constant 0 : index
      %c0_54 = arith.constant 0 : index
      %c0_55 = arith.constant 0 : index
      %98 = vector.load %arg7[%c0_53, %c0_54, %c0_55] : memref<2x8x32xf32, #tpu.memory_space<vmem>>, vector<2x8x32xf32>
      tpu.vector_store %arg7[%c0_53, %c0_54, %c0_55], %97 {strides = array<i32>} : memref<2x8x32xf32, #tpu.memory_space<vmem>>, vector<2x8x32xf32>,
    } else {
    }
    %c0 = arith.constant 0 : index
    %c0_1 = arith.constant 0 : index
    %c0_2 = arith.constant 0 : index
    %3 = vector.load %arg1[%c0, %c0_1, %c0_2] : memref<1x8x128xf32, #tpu.memory_space<vmem>>, vector<1x8x128xf32>
    %4 = vector.shape_cast %3 : vector<1x8x128xf32> to vector<8x128xf32>
    %c0_3 = arith.constant 0 : index
    %c0_4 = arith.constant 0 : index
    %c0_5 = arith.constant 0 : index
    %5 = vector.load %arg6[%c0_3, %c0_4, %c0_5] : memref<2x8x32xf32, #tpu.memory_space<vmem>>, vector<1x8x32xf32>
    %6 = vector.shape_cast %5 : vector<1x8x32xf32> to vector<8x32xf32>
    %c0_6 = arith.constant 0 : index
    %c0_7 = arith.constant 0 : index
    %c0_8 = arith.constant 0 : index
    %7 = vector.load %arg7[%c0_6, %c0_7, %c0_8] : memref<2x8x32xf32, #tpu.memory_space<vmem>>, vector<1x8x32xf32>
    %8 = vector.shape_cast %7 : vector<1x8x32xf32> to vector<8x32xf32>
    %c0_9 = arith.constant 0 : index
    %c0_10 = arith.constant 0 : index
    %c0_11 = arith.constant 0 : index
    %9 = vector.load %arg3[%c0_9, %c0_10, %c0_11] : memref<2x32x128xbf16, #tpu.memory_space<vmem>>, vector<1x32x128xbf16>
    %10 = vector.shape_cast %9 : vector<1x32x128xbf16> to vector<32x128xbf16>
    %11 = arith.truncf %6 : vector<8x32xf32> to vector<8x32xbf16>
    %cst = arith.constant dense<0.000000e+00> : vector<8x128xf32>
    %12 = tpu.matmul %11, %10, %cst {dimension_numbers = #tpu.dot_dimension_numbers<[1], [0], [0], [1], [0, 0, 1, 1], [], []>} : vector<8x32xbf16>, vector<32x128xbf16>, vector<8x128xf32> -> vector<8x128xf32>
    %13 = arith.addf %4, %12 : vector<8x128xf32>
    %14 = vector.extract_strided_slice %13 {offsets = [0, 0], sizes = [8, 32], strides = [1, 1]} : vector<8x128xf32> to vector<8x32xf32>
    %15 = arith.negf %14 : vector<8x32xf32>
    %16 = math.exp %15 : vector<8x32xf32>
    %cst_12 = arith.constant 1.000000e+00 : f32
    %17 = vector.broadcast %cst_12 : f32 to vector<8x32xf32>
    %18 = arith.addf %17, %16 : vector<8x32xf32>
    %19 = arith.divf %17, %18 : vector<8x32xf32>
    %20 = vector.extract_strided_slice %13 {offsets = [0, 32], sizes = [8, 32], strides = [1, 1]} : vector<8x128xf32> to vector<8x32xf32>
    %21 = arith.negf %20 : vector<8x32xf32>
    %22 = math.exp %21 : vector<8x32xf32>
    %cst_13 = arith.constant 1.000000e+00 : f32
    %23 = vector.broadcast %cst_13 : f32 to vector<8x32xf32>
    %24 = arith.addf %23, %22 : vector<8x32xf32>
    %25 = arith.divf %23, %24 : vector<8x32xf32>
    %26 = vector.extract_strided_slice %13 {offsets = [0, 64], sizes = [8, 32], strides = [1, 1]} : vector<8x128xf32> to vector<8x32xf32>
    %27 = math.tanh %26 : vector<8x32xf32>
    %28 = vector.extract_strided_slice %13 {offsets = [0, 96], sizes = [8, 32], strides = [1, 1]} : vector<8x128xf32> to vector<8x32xf32>
    %29 = arith.negf %28 : vector<8x32xf32>
    %30 = math.exp %29 : vector<8x32xf32>
    %cst_14 = arith.constant 1.000000e+00 : f32
    %31 = vector.broadcast %cst_14 : f32 to vector<8x32xf32>
    %32 = arith.addf %31, %30 : vector<8x32xf32>
    %33 = arith.divf %31, %32 : vector<8x32xf32>
    %34 = arith.mulf %25, %8 : vector<8x32xf32>
    %35 = arith.mulf %19, %27 : vector<8x32xf32>
    %36 = arith.addf %34, %35 : vector<8x32xf32>
    %37 = math.tanh %36 : vector<8x32xf32>
    %38 = arith.mulf %33, %37 : vector<8x32xf32>
    %c0_15 = arith.constant 0 : index
    %c0_16 = arith.constant 0 : index
    %c0_17 = arith.constant 0 : index
    %39 = vector.load %arg2[%c0_15, %c0_16, %c0_17] : memref<1x8x128xf32, #tpu.memory_space<vmem>>, vector<1x8x128xf32>
    %40 = vector.shape_cast %39 : vector<1x8x128xf32> to vector<8x128xf32>
    %c1 = arith.constant 1 : index
    %c0_18 = arith.constant 0 : index
    %c0_19 = arith.constant 0 : index
    %41 = vector.load %arg6[%c1, %c0_18, %c0_19] : memref<2x8x32xf32, #tpu.memory_space<vmem>>, vector<1x8x32xf32>
    %42 = vector.shape_cast %41 : vector<1x8x32xf32> to vector<8x32xf32>
    %c1_20 = arith.constant 1 : index
    %c0_21 = arith.constant 0 : index
    %c0_22 = arith.constant 0 : index
    %43 = vector.load %arg7[%c1_20, %c0_21, %c0_22] : memref<2x8x32xf32, #tpu.memory_space<vmem>>, vector<1x8x32xf32>
    %44 = vector.shape_cast %43 : vector<1x8x32xf32> to vector<8x32xf32>
    %c1_23 = arith.constant 1 : index
    %c0_24 = arith.constant 0 : index
    %c0_25 = arith.constant 0 : index
    %45 = vector.load %arg3[%c1_23, %c0_24, %c0_25] : memref<2x32x128xbf16, #tpu.memory_space<vmem>>, vector<1x32x128xbf16>
    %46 = vector.shape_cast %45 : vector<1x32x128xbf16> to vector<32x128xbf16>
    %47 = arith.truncf %42 : vector<8x32xf32> to vector<8x32xbf16>
    %cst_26 = arith.constant dense<0.000000e+00> : vector<8x128xf32>
    %48 = tpu.matmul %47, %46, %cst_26 {dimension_numbers = #tpu.dot_dimension_numbers<[1], [0], [0], [1], [0, 0, 1, 1], [], []>} : vector<8x32xbf16>, vector<32x128xbf16>, vector<8x128xf32> -> vector<8x128xf32>
    %49 = arith.addf %40, %48 : vector<8x128xf32>
    %50 = vector.extract_strided_slice %49 {offsets = [0, 0], sizes = [8, 32], strides = [1, 1]} : vector<8x128xf32> to vector<8x32xf32>
    %51 = arith.negf %50 : vector<8x32xf32>
    %52 = math.exp %51 : vector<8x32xf32>
    %cst_27 = arith.constant 1.000000e+00 : f32
    %53 = vector.broadcast %cst_27 : f32 to vector<8x32xf32>
    %54 = arith.addf %53, %52 : vector<8x32xf32>
    %55 = arith.divf %53, %54 : vector<8x32xf32>
    %56 = vector.extract_strided_slice %49 {offsets = [0, 32], sizes = [8, 32], strides = [1, 1]} : vector<8x128xf32> to vector<8x32xf32>
    %57 = arith.negf %56 : vector<8x32xf32>
    %58 = math.exp %57 : vector<8x32xf32>
    %cst_28 = arith.constant 1.000000e+00 : f32
    %59 = vector.broadcast %cst_28 : f32 to vector<8x32xf32>
    %60 = arith.addf %59, %58 : vector<8x32xf32>
    %61 = arith.divf %59, %60 : vector<8x32xf32>
    %62 = vector.extract_strided_slice %49 {offsets = [0, 64], sizes = [8, 32], strides = [1, 1]} : vector<8x128xf32> to vector<8x32xf32>
    %63 = math.tanh %62 : vector<8x32xf32>
    %64 = vector.extract_strided_slice %49 {offsets = [0, 96], sizes = [8, 32], strides = [1, 1]} : vector<8x128xf32> to vector<8x32xf32>
    %65 = arith.negf %64 : vector<8x32xf32>
    %66 = math.exp %65 : vector<8x32xf32>
    %cst_29 = arith.constant 1.000000e+00 : f32
    %67 = vector.broadcast %cst_29 : f32 to vector<8x32xf32>
    %68 = arith.addf %67, %66 : vector<8x32xf32>
    %69 = arith.divf %67, %68 : vector<8x32xf32>
    %70 = arith.mulf %61, %44 : vector<8x32xf32>
    %71 = arith.mulf %55, %63 : vector<8x32xf32>
    %72 = arith.addf %70, %71 : vector<8x32xf32>
    %73 = math.tanh %72 : vector<8x32xf32>
    %74 = arith.mulf %69, %73 : vector<8x32xf32>
    %c0_30 = arith.constant 0 : index
    %c0_31 = arith.constant 0 : index
    %c0_32 = arith.constant 0 : index
    %75 = vector.load %arg6[%c0_30, %c0_31, %c0_32] : memref<2x8x32xf32, #tpu.memory_space<vmem>>, vector<1x8x32xf32>
    %76 = vector.shape_cast %75 : vector<1x8x32xf32> to vector<8x32xf32>
    %77 = vector.shape_cast %38 : vector<8x32xf32> to vector<1x8x32xf32>
    tpu.vector_store %arg6[%c0_30, %c0_31, %c0_32], %77 {strides = array<i32>} : memref<2x8x32xf32, #tpu.memory_space<vmem>>, vector<1x8x32xf32>,
    %c0_33 = arith.constant 0 : index
    %c0_34 = arith.constant 0 : index
    %c0_35 = arith.constant 0 : index
    %78 = vector.load %arg7[%c0_33, %c0_34, %c0_35] : memref<2x8x32xf32, #tpu.memory_space<vmem>>, vector<1x8x32xf32>
    %79 = vector.shape_cast %78 : vector<1x8x32xf32> to vector<8x32xf32>
    %80 = vector.shape_cast %36 : vector<8x32xf32> to vector<1x8x32xf32>
    tpu.vector_store %arg7[%c0_33, %c0_34, %c0_35], %80 {strides = array<i32>} : memref<2x8x32xf32, #tpu.memory_space<vmem>>, vector<1x8x32xf32>,
    %c1_36 = arith.constant 1 : index
    %c0_37 = arith.constant 0 : index
    %c0_38 = arith.constant 0 : index
    %81 = vector.load %arg6[%c1_36, %c0_37, %c0_38] : memref<2x8x32xf32, #tpu.memory_space<vmem>>, vector<1x8x32xf32>
    %82 = vector.shape_cast %81 : vector<1x8x32xf32> to vector<8x32xf32>
    %83 = vector.shape_cast %74 : vector<8x32xf32> to vector<1x8x32xf32>
    tpu.vector_store %arg6[%c1_36, %c0_37, %c0_38], %83 {strides = array<i32>} : memref<2x8x32xf32, #tpu.memory_space<vmem>>, vector<1x8x32xf32>,
    %c1_39 = arith.constant 1 : index
    %c0_40 = arith.constant 0 : index
    %c0_41 = arith.constant 0 : index
    %84 = vector.load %arg7[%c1_39, %c0_40, %c0_41] : memref<2x8x32xf32, #tpu.memory_space<vmem>>, vector<1x8x32xf32>
    %85 = vector.shape_cast %84 : vector<1x8x32xf32> to vector<8x32xf32>
    %86 = vector.shape_cast %72 : vector<8x32xf32> to vector<1x8x32xf32>
    tpu.vector_store %arg7[%c1_39, %c0_40, %c0_41], %86 {strides = array<i32>} : memref<2x8x32xf32, #tpu.memory_space<vmem>>, vector<1x8x32xf32>,
    %87 = arith.truncf %38 : vector<8x32xf32> to vector<8x32xbf16>
    %c0_42 = arith.constant 0 : index
    %c0_43 = arith.constant 0 : index
    %c0_44 = arith.constant 0 : index
    %88 = vector.load %arg4[%c0_42, %c0_43, %c0_44] : memref<1x8x32xbf16, #tpu.memory_space<vmem>>, vector<1x8x32xbf16>
    %89 = vector.shape_cast %88 : vector<1x8x32xbf16> to vector<8x32xbf16>
    %90 = vector.shape_cast %87 : vector<8x32xbf16> to vector<1x8x32xbf16>
    tpu.vector_store %arg4[%c0_42, %c0_43, %c0_44], %90 {strides = array<i32>} : memref<1x8x32xbf16, #tpu.memory_space<vmem>>, vector<1x8x32xbf16>,
    %91 = arith.truncf %74 : vector<8x32xf32> to vector<8x32xbf16>
    %c0_45 = arith.constant 0 : index
    %c0_46 = arith.constant 0 : index
    %c0_47 = arith.constant 0 : index
    %92 = vector.load %arg5[%c0_45, %c0_46, %c0_47] : memref<1x8x32xbf16, #tpu.memory_space<vmem>>, vector<1x8x32xbf16>
    %93 = vector.shape_cast %92 : vector<1x8x32xbf16> to vector<8x32xbf16>
    %94 = vector.shape_cast %91 : vector<8x32xbf16> to vector<1x8x32xbf16>
    tpu.vector_store %arg5[%c0_45, %c0_46, %c0_47], %94 {strides = array<i32>} : memref<1x8x32xbf16, #tpu.memory_space<vmem>>, vector<1x8x32xbf16>,
    return
  }
  func.func @transform_0(%arg0: i32) -> (i32, i32, i32) {
    %c0_i32 = arith.constant 0 : i32
    %c0_i32_0 = arith.constant 0 : i32
    %c0_i32_1 = arith.constant 0 : i32
    return %arg0, %c0_i32, %c0_i32_0 : i32, i32, i32
  }
  func.func @transform_1(%arg0: i32) -> (i32, i32, i32) {
    %c7_i32 = arith.constant 7 : i32
    %0 = arith.subi %c7_i32, %arg0 : i32
    %c0_i32 = arith.constant 0 : i32
    %c1_i32 = arith.constant 1 : i32
    %c0_i32_0 = arith.constant 0 : i32
    return %0, %c0_i32, %c1_i32 : i32, i32, i32
  }
  func.func @transform_2(%arg0: i32) -> (i32, i32, i32) {
    %c0_i32 = arith.constant 0 : i32
    %c0_i32_0 = arith.constant 0 : i32
    %c0_i32_1 = arith.constant 0 : i32
    %c0_i32_2 = arith.constant 0 : i32
    return %c0_i32, %c0_i32_0, %c0_i32_1 : i32, i32, i32
  }
  func.func @transform_3(%arg0: i32) -> (i32, i32, i32) {
    %c0_i32 = arith.constant 0 : i32
    %c0_i32_0 = arith.constant 0 : i32
    %c0_i32_1 = arith.constant 0 : i32
    return %arg0, %c0_i32, %c0_i32_0 : i32, i32, i32
  }
  func.func @transform_4(%arg0: i32) -> (i32, i32, i32) {
    %c7_i32 = arith.constant 7 : i32
    %0 = arith.subi %c7_i32, %arg0 : i32
    %c0_i32 = arith.constant 0 : i32
    %c0_i32_0 = arith.constant 0 : i32
    %c0_i32_1 = arith.constant 0 : i32
    return %0, %c0_i32, %c0_i32_0 : i32, i32, i32
  }
}

module attributes {stable_mosaic.version = 11 : i64} {
  func.func @_bilstm_last_layer_kernel(%arg0: i32, %arg1: memref<1x8x128xf32, #tpu.memory_space<vmem>>, %arg2: memref<1x8x128xf32, #tpu.memory_space<vmem>>, %arg3: memref<2x32x128xbf16, #tpu.memory_space<vmem>>, %arg4: memref<2x32x4xf32, #tpu.memory_space<vmem>>, %arg5: memref<1x4xf32, #tpu.memory_space<vmem>>, %arg6: memref<8x4xf32, #tpu.memory_space<vmem>>, %arg7: memref<2x8x32xf32, #tpu.memory_space<vmem>>, %arg8: memref<2x8x32xf32, #tpu.memory_space<vmem>>) attributes {dimension_semantics = [#tpu.dimension_semantics<arbitrary>], iteration_bounds = array<i64: 8>, scalar_prefetch = 0 : i64, scratch_operands = 2 : i64, tpu.core_type = #tpu.core_type<tc>, window_params = [{transform_indices = @transform_0, window_bounds = array<i64: 1, 8, 128>}, {transform_indices = @transform_1, window_bounds = array<i64: 1, 8, 128>}, {pipeline_mode = #tpu.pipeline_mode<synchronous>, transform_indices = @transform_2, window_bounds = array<i64: 2, 32, 128>}, {pipeline_mode = #tpu.pipeline_mode<synchronous>, transform_indices = @transform_3, window_bounds = array<i64: 2, 32, 4>}, {pipeline_mode = #tpu.pipeline_mode<synchronous>, transform_indices = @transform_4, window_bounds = array<i64: 1, 4>}, {pipeline_mode = #tpu.pipeline_mode<synchronous>, transform_indices = @transform_5, window_bounds = array<i64: 8, 4>}]} {
    %c0_i32 = arith.constant 0 : i32
    %0 = arith.cmpi eq, %arg0, %c0_i32 : i32
    %1 = arith.extui %0 : i1 to i32
    %c0_i32_0 = arith.constant 0 : i32
    %2 = arith.cmpi ne, %1, %c0_i32_0 : i32
    scf.if %2 {
      %cst_45 = arith.constant 0.000000e+00 : f32
      %93 = vector.broadcast %cst_45 : f32 to vector<2x8x32xf32>
      %c0_46 = arith.constant 0 : index
      %c0_47 = arith.constant 0 : index
      %c0_48 = arith.constant 0 : index
      %94 = vector.load %arg7[%c0_46, %c0_47, %c0_48] : memref<2x8x32xf32, #tpu.memory_space<vmem>>, vector<2x8x32xf32>
      tpu.vector_store %arg7[%c0_46, %c0_47, %c0_48], %93 {strides = array<i32>} : memref<2x8x32xf32, #tpu.memory_space<vmem>>, vector<2x8x32xf32>,
      %cst_49 = arith.constant 0.000000e+00 : f32
      %95 = vector.broadcast %cst_49 : f32 to vector<2x8x32xf32>
      %c0_50 = arith.constant 0 : index
      %c0_51 = arith.constant 0 : index
      %c0_52 = arith.constant 0 : index
      %96 = vector.load %arg8[%c0_50, %c0_51, %c0_52] : memref<2x8x32xf32, #tpu.memory_space<vmem>>, vector<2x8x32xf32>
      tpu.vector_store %arg8[%c0_50, %c0_51, %c0_52], %95 {strides = array<i32>} : memref<2x8x32xf32, #tpu.memory_space<vmem>>, vector<2x8x32xf32>,
    } else {
    }
    %c0 = arith.constant 0 : index
    %c0_1 = arith.constant 0 : index
    %c0_2 = arith.constant 0 : index
    %3 = vector.load %arg1[%c0, %c0_1, %c0_2] : memref<1x8x128xf32, #tpu.memory_space<vmem>>, vector<1x8x128xf32>
    %4 = vector.shape_cast %3 : vector<1x8x128xf32> to vector<8x128xf32>
    %c0_3 = arith.constant 0 : index
    %c0_4 = arith.constant 0 : index
    %c0_5 = arith.constant 0 : index
    %5 = vector.load %arg7[%c0_3, %c0_4, %c0_5] : memref<2x8x32xf32, #tpu.memory_space<vmem>>, vector<1x8x32xf32>
    %6 = vector.shape_cast %5 : vector<1x8x32xf32> to vector<8x32xf32>
    %c0_6 = arith.constant 0 : index
    %c0_7 = arith.constant 0 : index
    %c0_8 = arith.constant 0 : index
    %7 = vector.load %arg8[%c0_6, %c0_7, %c0_8] : memref<2x8x32xf32, #tpu.memory_space<vmem>>, vector<1x8x32xf32>
    %8 = vector.shape_cast %7 : vector<1x8x32xf32> to vector<8x32xf32>
    %c0_9 = arith.constant 0 : index
    %c0_10 = arith.constant 0 : index
    %c0_11 = arith.constant 0 : index
    %9 = vector.load %arg3[%c0_9, %c0_10, %c0_11] : memref<2x32x128xbf16, #tpu.memory_space<vmem>>, vector<1x32x128xbf16>
    %10 = vector.shape_cast %9 : vector<1x32x128xbf16> to vector<32x128xbf16>
    %11 = arith.truncf %6 : vector<8x32xf32> to vector<8x32xbf16>
    %cst = arith.constant dense<0.000000e+00> : vector<8x128xf32>
    %12 = tpu.matmul %11, %10, %cst {dimension_numbers = #tpu.dot_dimension_numbers<[1], [0], [0], [1], [0, 0, 1, 1], [], []>} : vector<8x32xbf16>, vector<32x128xbf16>, vector<8x128xf32> -> vector<8x128xf32>
    %13 = arith.addf %4, %12 : vector<8x128xf32>
    %14 = vector.extract_strided_slice %13 {offsets = [0, 0], sizes = [8, 32], strides = [1, 1]} : vector<8x128xf32> to vector<8x32xf32>
    %15 = arith.negf %14 : vector<8x32xf32>
    %16 = math.exp %15 : vector<8x32xf32>
    %cst_12 = arith.constant 1.000000e+00 : f32
    %17 = vector.broadcast %cst_12 : f32 to vector<8x32xf32>
    %18 = arith.addf %17, %16 : vector<8x32xf32>
    %19 = arith.divf %17, %18 : vector<8x32xf32>
    %20 = vector.extract_strided_slice %13 {offsets = [0, 32], sizes = [8, 32], strides = [1, 1]} : vector<8x128xf32> to vector<8x32xf32>
    %21 = arith.negf %20 : vector<8x32xf32>
    %22 = math.exp %21 : vector<8x32xf32>
    %cst_13 = arith.constant 1.000000e+00 : f32
    %23 = vector.broadcast %cst_13 : f32 to vector<8x32xf32>
    %24 = arith.addf %23, %22 : vector<8x32xf32>
    %25 = arith.divf %23, %24 : vector<8x32xf32>
    %26 = vector.extract_strided_slice %13 {offsets = [0, 64], sizes = [8, 32], strides = [1, 1]} : vector<8x128xf32> to vector<8x32xf32>
    %27 = math.tanh %26 : vector<8x32xf32>
    %28 = vector.extract_strided_slice %13 {offsets = [0, 96], sizes = [8, 32], strides = [1, 1]} : vector<8x128xf32> to vector<8x32xf32>
    %29 = arith.negf %28 : vector<8x32xf32>
    %30 = math.exp %29 : vector<8x32xf32>
    %cst_14 = arith.constant 1.000000e+00 : f32
    %31 = vector.broadcast %cst_14 : f32 to vector<8x32xf32>
    %32 = arith.addf %31, %30 : vector<8x32xf32>
    %33 = arith.divf %31, %32 : vector<8x32xf32>
    %34 = arith.mulf %25, %8 : vector<8x32xf32>
    %35 = arith.mulf %19, %27 : vector<8x32xf32>
    %36 = arith.addf %34, %35 : vector<8x32xf32>
    %37 = math.tanh %36 : vector<8x32xf32>
    %38 = arith.mulf %33, %37 : vector<8x32xf32>
    %c0_15 = arith.constant 0 : index
    %c0_16 = arith.constant 0 : index
    %c0_17 = arith.constant 0 : index
    %39 = vector.load %arg2[%c0_15, %c0_16, %c0_17] : memref<1x8x128xf32, #tpu.memory_space<vmem>>, vector<1x8x128xf32>
    %40 = vector.shape_cast %39 : vector<1x8x128xf32> to vector<8x128xf32>
    %c1 = arith.constant 1 : index
    %c0_18 = arith.constant 0 : index
    %c0_19 = arith.constant 0 : index
    %41 = vector.load %arg7[%c1, %c0_18, %c0_19] : memref<2x8x32xf32, #tpu.memory_space<vmem>>, vector<1x8x32xf32>
    %42 = vector.shape_cast %41 : vector<1x8x32xf32> to vector<8x32xf32>
    %c1_20 = arith.constant 1 : index
    %c0_21 = arith.constant 0 : index
    %c0_22 = arith.constant 0 : index
    %43 = vector.load %arg8[%c1_20, %c0_21, %c0_22] : memref<2x8x32xf32, #tpu.memory_space<vmem>>, vector<1x8x32xf32>
    %44 = vector.shape_cast %43 : vector<1x8x32xf32> to vector<8x32xf32>
    %c1_23 = arith.constant 1 : index
    %c0_24 = arith.constant 0 : index
    %c0_25 = arith.constant 0 : index
    %45 = vector.load %arg3[%c1_23, %c0_24, %c0_25] : memref<2x32x128xbf16, #tpu.memory_space<vmem>>, vector<1x32x128xbf16>
    %46 = vector.shape_cast %45 : vector<1x32x128xbf16> to vector<32x128xbf16>
    %47 = arith.truncf %42 : vector<8x32xf32> to vector<8x32xbf16>
    %cst_26 = arith.constant dense<0.000000e+00> : vector<8x128xf32>
    %48 = tpu.matmul %47, %46, %cst_26 {dimension_numbers = #tpu.dot_dimension_numbers<[1], [0], [0], [1], [0, 0, 1, 1], [], []>} : vector<8x32xbf16>, vector<32x128xbf16>, vector<8x128xf32> -> vector<8x128xf32>
    %49 = arith.addf %40, %48 : vector<8x128xf32>
    %50 = vector.extract_strided_slice %49 {offsets = [0, 0], sizes = [8, 32], strides = [1, 1]} : vector<8x128xf32> to vector<8x32xf32>
    %51 = arith.negf %50 : vector<8x32xf32>
    %52 = math.exp %51 : vector<8x32xf32>
    %cst_27 = arith.constant 1.000000e+00 : f32
    %53 = vector.broadcast %cst_27 : f32 to vector<8x32xf32>
    %54 = arith.addf %53, %52 : vector<8x32xf32>
    %55 = arith.divf %53, %54 : vector<8x32xf32>
    %56 = vector.extract_strided_slice %49 {offsets = [0, 32], sizes = [8, 32], strides = [1, 1]} : vector<8x128xf32> to vector<8x32xf32>
    %57 = arith.negf %56 : vector<8x32xf32>
    %58 = math.exp %57 : vector<8x32xf32>
    %cst_28 = arith.constant 1.000000e+00 : f32
    %59 = vector.broadcast %cst_28 : f32 to vector<8x32xf32>
    %60 = arith.addf %59, %58 : vector<8x32xf32>
    %61 = arith.divf %59, %60 : vector<8x32xf32>
    %62 = vector.extract_strided_slice %49 {offsets = [0, 64], sizes = [8, 32], strides = [1, 1]} : vector<8x128xf32> to vector<8x32xf32>
    %63 = math.tanh %62 : vector<8x32xf32>
    %64 = vector.extract_strided_slice %49 {offsets = [0, 96], sizes = [8, 32], strides = [1, 1]} : vector<8x128xf32> to vector<8x32xf32>
    %65 = arith.negf %64 : vector<8x32xf32>
    %66 = math.exp %65 : vector<8x32xf32>
    %cst_29 = arith.constant 1.000000e+00 : f32
    %67 = vector.broadcast %cst_29 : f32 to vector<8x32xf32>
    %68 = arith.addf %67, %66 : vector<8x32xf32>
    %69 = arith.divf %67, %68 : vector<8x32xf32>
    %70 = arith.mulf %61, %44 : vector<8x32xf32>
    %71 = arith.mulf %55, %63 : vector<8x32xf32>
    %72 = arith.addf %70, %71 : vector<8x32xf32>
    %73 = math.tanh %72 : vector<8x32xf32>
    %74 = arith.mulf %69, %73 : vector<8x32xf32>
    %c0_30 = arith.constant 0 : index
    %c0_31 = arith.constant 0 : index
    %c0_32 = arith.constant 0 : index
    %75 = vector.load %arg7[%c0_30, %c0_31, %c0_32] : memref<2x8x32xf32, #tpu.memory_space<vmem>>, vector<1x8x32xf32>
    %76 = vector.shape_cast %75 : vector<1x8x32xf32> to vector<8x32xf32>
    %77 = vector.shape_cast %38 : vector<8x32xf32> to vector<1x8x32xf32>
    tpu.vector_store %arg7[%c0_30, %c0_31, %c0_32], %77 {strides = array<i32>} : memref<2x8x32xf32, #tpu.memory_space<vmem>>, vector<1x8x32xf32>,
    %c0_33 = arith.constant 0 : index
    %c0_34 = arith.constant 0 : index
    %c0_35 = arith.constant 0 : index
    %78 = vector.load %arg8[%c0_33, %c0_34, %c0_35] : memref<2x8x32xf32, #tpu.memory_space<vmem>>, vector<1x8x32xf32>
    %79 = vector.shape_cast %78 : vector<1x8x32xf32> to vector<8x32xf32>
    %80 = vector.shape_cast %36 : vector<8x32xf32> to vector<1x8x32xf32>
    tpu.vector_store %arg8[%c0_33, %c0_34, %c0_35], %80 {strides = array<i32>} : memref<2x8x32xf32, #tpu.memory_space<vmem>>, vector<1x8x32xf32>,
    %c1_36 = arith.constant 1 : index
    %c0_37 = arith.constant 0 : index
    %c0_38 = arith.constant 0 : index
    %81 = vector.load %arg7[%c1_36, %c0_37, %c0_38] : memref<2x8x32xf32, #tpu.memory_space<vmem>>, vector<1x8x32xf32>
    %82 = vector.shape_cast %81 : vector<1x8x32xf32> to vector<8x32xf32>
    %83 = vector.shape_cast %74 : vector<8x32xf32> to vector<1x8x32xf32>
    tpu.vector_store %arg7[%c1_36, %c0_37, %c0_38], %83 {strides = array<i32>} : memref<2x8x32xf32, #tpu.memory_space<vmem>>, vector<1x8x32xf32>,
    %c1_39 = arith.constant 1 : index
    %c0_40 = arith.constant 0 : index
    %c0_41 = arith.constant 0 : index
    %84 = vector.load %arg8[%c1_39, %c0_40, %c0_41] : memref<2x8x32xf32, #tpu.memory_space<vmem>>, vector<1x8x32xf32>
    %85 = vector.shape_cast %84 : vector<1x8x32xf32> to vector<8x32xf32>
    %86 = vector.shape_cast %72 : vector<8x32xf32> to vector<1x8x32xf32>
    tpu.vector_store %arg8[%c1_39, %c0_40, %c0_41], %86 {strides = array<i32>} : memref<2x8x32xf32, #tpu.memory_space<vmem>>, vector<1x8x32xf32>,
    %c0_i32_42 = arith.constant 0 : i32
    %87 = arith.cmpi eq, %arg0, %c0_i32_42 : i32
    %88 = arith.extui %87 : i1 to i32
    %c0_i32_43 = arith.constant 0 : i32
    %89 = arith.cmpi ne, %88, %c0_i32_43 : i32
    scf.if %89 {
      %c0_45 = arith.constant 0 : index
      %c0_46 = arith.constant 0 : index
      %93 = vector.load %arg5[%c0_45, %c0_46] : memref<1x4xf32, #tpu.memory_space<vmem>>, vector<1x4xf32>
      %c1_47 = arith.constant 1 : index
      %c0_48 = arith.constant 0 : index
      %c0_49 = arith.constant 0 : index
      %94 = vector.load %arg4[%c1_47, %c0_48, %c0_49] : memref<2x32x4xf32, #tpu.memory_space<vmem>>, vector<1x32x4xf32>
      %95 = vector.shape_cast %94 : vector<1x32x4xf32> to vector<32x4xf32>
      %cst_50 = arith.constant dense<0.000000e+00> : vector<8x4xf32>
      %96 = tpu.matmul %74, %95, %cst_50 {dimension_numbers = #tpu.dot_dimension_numbers<[1], [0], [0], [1], [0, 0, 1, 1], [], []>} : vector<8x32xf32>, vector<32x4xf32>, vector<8x4xf32> -> vector<8x4xf32>
      %97 = vector.broadcast %93 : vector<1x4xf32> to vector<8x4xf32>
      %98 = arith.addf %97, %96 : vector<8x4xf32>
      %c0_51 = arith.constant 0 : index
      %c0_52 = arith.constant 0 : index
      %99 = vector.load %arg6[%c0_51, %c0_52] : memref<8x4xf32, #tpu.memory_space<vmem>>, vector<8x4xf32>
      tpu.vector_store %arg6[%c0_51, %c0_52], %98 {strides = array<i32>} : memref<8x4xf32, #tpu.memory_space<vmem>>, vector<8x4xf32>,
    } else {
    }
    %c7_i32 = arith.constant 7 : i32
    %90 = arith.cmpi eq, %arg0, %c7_i32 : i32
    %91 = arith.extui %90 : i1 to i32
    %c0_i32_44 = arith.constant 0 : i32
    %92 = arith.cmpi ne, %91, %c0_i32_44 : i32
    scf.if %92 {
      %c0_45 = arith.constant 0 : index
      %c0_46 = arith.constant 0 : index
      %93 = vector.load %arg6[%c0_45, %c0_46] : memref<8x4xf32, #tpu.memory_space<vmem>>, vector<8x4xf32>
      %c0_47 = arith.constant 0 : index
      %c0_48 = arith.constant 0 : index
      %c0_49 = arith.constant 0 : index
      %94 = vector.load %arg4[%c0_47, %c0_48, %c0_49] : memref<2x32x4xf32, #tpu.memory_space<vmem>>, vector<1x32x4xf32>
      %95 = vector.shape_cast %94 : vector<1x32x4xf32> to vector<32x4xf32>
      %cst_50 = arith.constant dense<0.000000e+00> : vector<8x4xf32>
      %96 = tpu.matmul %38, %95, %cst_50 {dimension_numbers = #tpu.dot_dimension_numbers<[1], [0], [0], [1], [0, 0, 1, 1], [], []>} : vector<8x32xf32>, vector<32x4xf32>, vector<8x4xf32> -> vector<8x4xf32>
      %97 = arith.addf %93, %96 : vector<8x4xf32>
      %c0_51 = arith.constant 0 : index
      %c0_52 = arith.constant 0 : index
      %98 = vector.load %arg6[%c0_51, %c0_52] : memref<8x4xf32, #tpu.memory_space<vmem>>, vector<8x4xf32>
      tpu.vector_store %arg6[%c0_51, %c0_52], %97 {strides = array<i32>} : memref<8x4xf32, #tpu.memory_space<vmem>>, vector<8x4xf32>,
    } else {
    }
    return
  }
  func.func @transform_0(%arg0: i32) -> (i32, i32, i32) {
    %c0_i32 = arith.constant 0 : i32
    %c0_i32_0 = arith.constant 0 : i32
    %c0_i32_1 = arith.constant 0 : i32
    return %arg0, %c0_i32, %c0_i32_0 : i32, i32, i32
  }
  func.func @transform_1(%arg0: i32) -> (i32, i32, i32) {
    %c7_i32 = arith.constant 7 : i32
    %0 = arith.subi %c7_i32, %arg0 : i32
    %c0_i32 = arith.constant 0 : i32
    %c1_i32 = arith.constant 1 : i32
    %c0_i32_0 = arith.constant 0 : i32
    return %0, %c0_i32, %c1_i32 : i32, i32, i32
  }
  func.func @transform_2(%arg0: i32) -> (i32, i32, i32) {
    %c0_i32 = arith.constant 0 : i32
    %c0_i32_0 = arith.constant 0 : i32
    %c0_i32_1 = arith.constant 0 : i32
    %c0_i32_2 = arith.constant 0 : i32
    return %c0_i32, %c0_i32_0, %c0_i32_1 : i32, i32, i32
  }
  func.func @transform_3(%arg0: i32) -> (i32, i32, i32) {
    %c0_i32 = arith.constant 0 : i32
    %c0_i32_0 = arith.constant 0 : i32
    %c0_i32_1 = arith.constant 0 : i32
    %c0_i32_2 = arith.constant 0 : i32
    return %c0_i32, %c0_i32_0, %c0_i32_1 : i32, i32, i32
  }
  func.func @transform_4(%arg0: i32) -> (i32, i32) {
    %c0_i32 = arith.constant 0 : i32
    %c0_i32_0 = arith.constant 0 : i32
    %c0_i32_1 = arith.constant 0 : i32
    return %c0_i32, %c0_i32_0 : i32, i32
  }
  func.func @transform_5(%arg0: i32) -> (i32, i32) {
    %c0_i32 = arith.constant 0 : i32
    %c0_i32_0 = arith.constant 0 : i32
    %c0_i32_1 = arith.constant 0 : i32
    return %c0_i32, %c0_i32_0 : i32, i32
  }
}

</mosaic_0001>

<bundles_post_ra>
// kernel: bilstm_net_forward.4
= control target key start
LH: loop header
LB: loop body
LE: loop exit
PB: predicated region body
PF: predicated region fallthrough
CT: control target
= control target key end

     0   :  { %v193_v1 = vmov 0   ;;  %vm67_vm0 = vcmask 130048   ;;  %v27_v7 = vlaneseq  ;;  %s283_s1 = inlined_call_operand.vmem [shape: bf16[16,256], index: 1, kind: input, shape index: {}]   ;;  %s284_s0 = inlined_call_operand.vmem [shape: bf16[64,16], index: 0, kind: input, shape index: {}]   ;;  %s285_s2 = inlined_call_operand.vmem [shape: f32[1,256], index: 2, kind: input, shape index: {}]   ;;  %s286_s3 = inlined_call_operand.vmem [shape: f32[64,256], index: 3, kind: output, shape index: {}]  }
   0x1   :  { %v186_v0 = vld [vmem:[%s283_s1 + $0x4] ss:$8 sps:$4 sm:$0xff]   ;;  %112 = vmatprep.mubr.bf16.mxu0 %v193_v1  ;;  %132 = vmatprep.mubr.bf16.mxu1 %v193_v1  ;;  %v188_v2 = vld [vmem:[%s283_s1] ss:$8 sps:$4 sm:$0xff]   ;;  %v190_v4 = vld [vmem:[%s284_s0 + $0x10] sm:$0xff]  }
   0x2   :  { %94 = vmatprep.subr.bf16.mxu0 %v186_v0  ;;  %183 = vmatprep.subr.bf16.mxu1 %v186_v0  ;;  %v189_v3 = vld [vmem:[%s284_s0] sm:$0xff]   ;;  %v191_v5 = vld [vmem:[%s284_s0 + $0x8] sm:$0xff]   ;;  %v192_v6 = vld [vmem:[%s284_s0 + $0x18] sm:$0xff]   ;;  %v28_v8 = vshrl.u32 %v27_v7, 7 }
   0x3   :  { %95 = vmatpush1.bf16.msra.mxu0 %v188_v2  ;;  %184 = vmatpush1.bf16.msra.mxu1 %v188_v2  ;;  %v25_v10 = vld [vmem:[%s285_s2] sm:$0x3] }
   0x4   :  { %v29_v9 = vsub.s32 0, %v28_v8  ;;  %v33_v11 = vsub.s32 1, %v28_v8 }
   0x6   :  { %179 = vmatmul.mubr.msk.bf16.vlgmr.msra.gmra.mxu0 %vm67_vm0, %v189_v3  ;;  %181 = vmatmul.mubr.msk.bf16.vlgmr.msra.gmra.mxu1 %vm67_vm0, %v190_v4  ;;  %v30_v12 = vrot.slane %v25_v10, %v29_v9  ;;  %v34_v13 = vrot.slane %v25_v10, %v33_v11 }
   0x7   :  { %122 = vmatprep.mubr.bf16.mxu0 %v193_v1  ;;  %142 = vmatprep.mubr.bf16.mxu1 %v193_v1 }
   0xe   :  { %180 = vmatmul.mubr.msk.bf16.gmra.mxu0 %vm67_vm0, %v191_v5  ;;  %182 = vmatmul.mubr.msk.bf16.gmra.mxu1 %vm67_vm0, %v192_v6 }
  0xc6   :  { %v114_v14 = vpop.f32.mrf.mxu0  ;;  %v134_v15 = vpop.f32.mrf.mxu1 }
  0xc7   :  { %v115_v16 = vadd.f32 %v114_v14, %v30_v12  ;;  %v135_v17 = vadd.f32 %v134_v15, %v30_v12 }
  0xc8   :  { %v116_v18 = vpop.f32.mrf.mxu0  ;;  %v136_v19 = vpop.f32.mrf.mxu1 }
  0xc9   :  { %153 = vst [vmem:[%s286_s3] sm:$0xff] %v115_v16  ;;  %161 = vst [vmem:[%s286_s3 + $0x40] sm:$0xff] %v135_v17  ;;  %v117_v20 = vadd.f32 %v116_v18, %v34_v13  ;;  %v137_v21 = vadd.f32 %v136_v19, %v34_v13 }
  0xca   :  { %v118_v22 = vpop.f32.mrf.mxu0  ;;  %v138_v23 = vpop.f32.mrf.mxu1 }
  0xcb   :  { %154 = vst [vmem:[%s286_s3 + $0x8] sm:$0xff] %v117_v20  ;;  %162 = vst [vmem:[%s286_s3 + $0x48] sm:$0xff] %v137_v21  ;;  %v119_v24 = vadd.f32 %v118_v22, %v30_v12  ;;  %v139_v25 = vadd.f32 %v138_v23, %v30_v12 }
  0xcc   :  { %v120_v26 = vpop.f32.mrf.mxu0  ;;  %v140_v27 = vpop.f32.mrf.mxu1 }
  0xcd   :  { %155 = vst [vmem:[%s286_s3 + $0x10] sm:$0xff] %v119_v24  ;;  %163 = vst [vmem:[%s286_s3 + $0x50] sm:$0xff] %v139_v25  ;;  %v121_v28 = vadd.f32 %v120_v26, %v34_v13  ;;  %v141_v29 = vadd.f32 %v140_v27, %v34_v13 }
  0xce   :  { %v124_v30 = vpop.f32.mrf.mxu0  ;;  %v144_v31 = vpop.f32.mrf.mxu1 }
  0xcf   :  { %156 = vst [vmem:[%s286_s3 + $0x18] sm:$0xff] %v121_v28  ;;  %164 = vst [vmem:[%s286_s3 + $0x58] sm:$0xff] %v141_v29  ;;  %v125_v32 = vadd.f32 %v124_v30, %v30_v12  ;;  %v145_v33 = vadd.f32 %v144_v31, %v30_v12 }
  0xd0   :  { %v126_v34 = vpop.f32.mrf.mxu0  ;;  %v146_v35 = vpop.f32.mrf.mxu1 }
  0xd1   :  { %157 = vst [vmem:[%s286_s3 + $0x20] sm:$0xff] %v125_v32  ;;  %165 = vst [vmem:[%s286_s3 + $0x60] sm:$0xff] %v145_v33  ;;  %v127_v36 = vadd.f32 %v126_v34, %v34_v13  ;;  %v147_v37 = vadd.f32 %v146_v35, %v34_v13 }
  0xd2   :  { %v128_v38 = vpop.f32.mrf.mxu0  ;;  %v148_v39 = vpop.f32.mrf.mxu1 }
  0xd3   :  { %158 = vst [vmem:[%s286_s3 + $0x28] sm:$0xff] %v127_v36  ;;  %166 = vst [vmem:[%s286_s3 + $0x68] sm:$0xff] %v147_v37  ;;  %v129_v40 = vadd.f32 %v128_v38, %v30_v12  ;;  %v149_v41 = vadd.f32 %v148_v39, %v30_v12 }
  0xd4   :  { %v130_v42 = vpop.f32.mrf.mxu0  ;;  %v150_v43 = vpop.f32.mrf.mxu1 }
  0xd5   :  { %159 = vst [vmem:[%s286_s3 + $0x30] sm:$0xff] %v129_v40  ;;  %167 = vst [vmem:[%s286_s3 + $0x70] sm:$0xff] %v149_v41  ;;  %v131_v44 = vadd.f32 %v130_v42, %v34_v13  ;;  %v151_v45 = vadd.f32 %v150_v43, %v34_v13 }
  0xd7   :  { %160 = vst [vmem:[%s286_s3 + $0x38] sm:$0xff] %v131_v44  ;;  %168 = vst [vmem:[%s286_s3 + $0x78] sm:$0xff] %v151_v45 }

// kernel: bilstm_net_forward.6
= control target key start
LH: loop header
LB: loop body
LE: loop exit
PB: predicated region body
PF: predicated region fallthrough
CT: control target
= control target key end

     0   :  { %v389_v1 = vmov 0   ;;  %vm85_vm0 = vcmask 261120   ;;  %v298_v17 = vlaneseq  ;;  %s547_s3 = inlined_call_operand.vmem [shape: bf16[32,256], index: 3, kind: input, shape index: {}]   ;;  %s548_s2 = inlined_call_operand.vmem [shape: bf16[32,256], index: 2, kind: input, shape index: {}]   ;;  %s549_s1 = inlined_call_operand.vmem [shape: bf16[64,32], index: 1, kind: input, shape index: {}]   ;;  %s550_s0 = inlined_call_operand.vmem [shape: bf16[64,32], index: 0, kind: input, shape index: {}]   ;;  %s551_s4 = inlined_call_operand.vmem [shape: f32[1,256], index: 4, kind: input, shape index: {}]   ;;  %s552_s5 = inlined_call_operand.vmem [shape: f32[64,256], index: 5, kind: output, shape index: {}]  }
   0x1   :  { %v369_v0 = vld [vmem:[%s547_s3 + $0x14] ss:$8 sps:$4 sm:$0xff]   ;;  %130 = vmatprep.mubr.bf16.mxu0 %v389_v1  ;;  %255 = vmatprep.mubr.bf16.mxu1 %v389_v1  ;;  %v373_v3 = vld [vmem:[%s547_s3 + $0x10] ss:$8 sps:$4 sm:$0xff]   ;;  %v375_v5 = vld [vmem:[%s547_s3 + $0x4] ss:$8 sps:$4 sm:$0xff]  }
   0x2   :  { %v371_v2 = vld [vmem:[%s548_s2 + $0x14] ss:$8 sps:$4 sm:$0xff]   ;;  %110 = vmatprep.subr.bf16.mxu0 %v369_v0  ;;  %v374_v4 = vld [vmem:[%s548_s2 + $0x10] ss:$8 sps:$4 sm:$0xff]   ;;  %v377_v6 = vld [vmem:[%s548_s2 + $0x4] ss:$8 sps:$4 sm:$0xff]  }
   0x3   :  { %235 = vmatprep.subr.bf16.mxu1 %v371_v2  ;;  %111 = vmatpush1.bf16.msra.mxu0 %v373_v3  ;;  %v379_v7 = vld [vmem:[%s547_s3] ss:$8 sps:$4 sm:$0xff]   ;;  %v385_v13 = vld [vmem:[%s549_s1 + $0x10] sm:$0xff]   ;;  %v387_v15 = vld [vmem:[%s549_s1 + $0x18] sm:$0xff]   ;;  %v299_v18 = vshrl.u32 %v298_v17, 7 }
   0x4   :  { %236 = vmatpush1.bf16.msra.mxu1 %v374_v4  ;;  %112 = vmatprep.subr.bf16.mxu0 %v375_v5  ;;  %v380_v8 = vld [vmem:[%s548_s2] ss:$8 sps:$4 sm:$0xff]   ;;  %v386_v14 = vld [vmem:[%s550_s0 + $0x10] sm:$0xff]   ;;  %v388_v16 = vld [vmem:[%s550_s0 + $0x18] sm:$0xff]  }
   0x5   :  { %237 = vmatprep.subr.bf16.mxu1 %v377_v6  ;;  %v381_v9 = vld [vmem:[%s549_s1] sm:$0xff]   ;;  %v383_v11 = vld [vmem:[%s549_s1 + $0x8] sm:$0xff]   ;;  %v300_v19 = vsub.s32 0, %v299_v18  ;;  %v304_v21 = vsub.s32 1, %v299_v18 }
   0x6   :  { %v382_v10 = vld [vmem:[%s550_s0] sm:$0xff]   ;;  %v384_v12 = vld [vmem:[%s550_s0 + $0x8] sm:$0xff]  }
   0x7   :  { %113 = vmatpush1.bf16.msra.mxu0 %v379_v7  ;;  %v296_v20 = vld [vmem:[%s551_s4] sm:$0x3] }
   0x8   :  { %238 = vmatpush1.bf16.msra.mxu1 %v380_v8  ;;  %v479_v22 = vrot.slane %v296_v20, %v300_v19  ;;  %v481_v26 = vrot.slane %v296_v20, %v304_v21 }
   0xa   :  { %352 = vmatmul.mubr.msk.bf16.vlgmr.msra.gmra.mxu0 %vm85_vm0, %v381_v9 }
   0xb   :  { %364 = vmatmul.mubr.msk.bf16.vlgmr.msra.gmra.mxu1 %vm85_vm0, %v382_v10  ;;  %140 = vmatprep.mubr.bf16.mxu0 %v389_v1 }
   0xc   :  { %265 = vmatprep.mubr.bf16.mxu1 %v389_v1 }
  0x12   :  { %353 = vmatmul.mubr.msk.bf16.gmra.mxu0 %vm85_vm0, %v383_v11 }
  0x13   :  { %365 = vmatmul.mubr.msk.bf16.gmra.mxu1 %vm85_vm0, %v384_v12  ;;  %150 = vmatprep.mubr.bf16.mxu0 %v389_v1 }
  0x14   :  { %275 = vmatprep.mubr.bf16.mxu1 %v389_v1 }
  0x1a   :  { %354 = vmatmul.mubr.msk.bf16.gmra.mxu0 %vm85_vm0, %v385_v13 }
  0x1b   :  { %366 = vmatmul.mubr.msk.bf16.gmra.mxu1 %vm85_vm0, %v386_v14  ;;  %160 = vmatprep.mubr.bf16.mxu0 %v389_v1 }
  0x1c   :  { %285 = vmatprep.mubr.bf16.mxu1 %v389_v1 }
  0x22   :  { %355 = vmatmul.mubr.msk.bf16.gmra.mxu0 %vm85_vm0, %v387_v15 }
  0x23   :  { %367 = vmatmul.mubr.msk.bf16.gmra.mxu1 %vm85_vm0, %v388_v16 }
  0xca   :  { %v132_v23 = vpop.f32.mrf.mxu0 }
  0xcb   :  { %v257_v24 = vpop.f32.mrf.mxu1 }
  0xcc   :  { %v258_v25 = vadd.f32 %v257_v24, %v132_v23  ;;  %v134_v27 = vpop.f32.mrf.mxu0 }
  0xcd   :  { %v259_v28 = vpop.f32.mrf.mxu1 }
  0xce   :  { %v308_v29 = vadd.f32 %v479_v22, %v258_v25  ;;  %v260_v30 = vadd.f32 %v259_v28, %v134_v27  ;;  %v136_v31 = vpop.f32.mrf.mxu0 }
  0xcf   :  { %v261_v32 = vpop.f32.mrf.mxu1 }
  0xd0   :  { %324 = vst [vmem:[%s552_s5] sm:$0xff] %v308_v29  ;;  %v309_v33 = vadd.f32 %v481_v26, %v260_v30  ;;  %v262_v34 = vadd.f32 %v261_v32, %v136_v31  ;;  %v138_v35 = vpop.f32.mrf.mxu0 }
  0xd1   :  { %v263_v36 = vpop.f32.mrf.mxu1 }
  0xd2   :  { %325 = vst [vmem:[%s552_s5 + $0x8] sm:$0xff] %v309_v33  ;;  %v310_v37 = vadd.f32 %v479_v22, %v262_v34  ;;  %v264_v38 = vadd.f32 %v263_v36, %v138_v35  ;;  %v142_v39 = vpop.f32.mrf.mxu0 }
  0xd3   :  { %v267_v40 = vpop.f32.mrf.mxu1 }
  0xd4   :  { %326 = vst [vmem:[%s552_s5 + $0x10] sm:$0xff] %v310_v37  ;;  %v311_v41 = vadd.f32 %v481_v26, %v264_v38  ;;  %v268_v42 = vadd.f32 %v267_v40, %v142_v39  ;;  %v144_v43 = vpop.f32.mrf.mxu0 }
  0xd5   :  { %v269_v44 = vpop.f32.mrf.mxu1 }
  0xd6   :  { %327 = vst [vmem:[%s552_s5 + $0x18] sm:$0xff] %v311_v41  ;;  %v312_v45 = vadd.f32 %v479_v22, %v268_v42  ;;  %v270_v46 = vadd.f32 %v269_v44, %v144_v43  ;;  %v146_v47 = vpop.f32.mrf.mxu0 }
  0xd7   :  { %v271_v48 = vpop.f32.mrf.mxu1 }
  0xd8   :  { %328 = vst [vmem:[%s552_s5 + $0x20] sm:$0xff] %v312_v45  ;;  %v313_v49 = vadd.f32 %v481_v26, %v270_v46  ;;  %v272_v50 = vadd.f32 %v271_v48, %v146_v47  ;;  %v148_v51 = vpop.f32.mrf.mxu0 }
  0xd9   :  { %v273_v52 = vpop.f32.mrf.mxu1 }
  0xda   :  { %329 = vst [vmem:[%s552_s5 + $0x28] sm:$0xff] %v313_v49  ;;  %v314_v53 = vadd.f32 %v479_v22, %v272_v50  ;;  %v274_v54 = vadd.f32 %v273_v52, %v148_v51  ;;  %v152_v55 = vpop.f32.mrf.mxu0 }
  0xdb   :  { %v277_v56 = vpop.f32.mrf.mxu1 }
  0xdc   :  { %330 = vst [vmem:[%s552_s5 + $0x30] sm:$0xff] %v314_v53  ;;  %v315_v57 = vadd.f32 %v481_v26, %v274_v54  ;;  %v278_v58 = vadd.f32 %v277_v56, %v152_v55  ;;  %v154_v59 = vpop.f32.mrf.mxu0 }
  0xdd   :  { %v279_v60 = vpop.f32.mrf.mxu1 }
  0xde   :  { %331 = vst [vmem:[%s552_s5 + $0x38] sm:$0xff] %v315_v57  ;;  %v316_v61 = vadd.f32 %v479_v22, %v278_v58  ;;  %v280_v62 = vadd.f32 %v279_v60, %v154_v59  ;;  %v156_v63 = vpop.f32.mrf.mxu0 }
  0xdf   :  { %v281_v0 = vpop.f32.mrf.mxu1 }
  0xe0   :  { %332 = vst [vmem:[%s552_s5 + $0x40] sm:$0xff] %v316_v61  ;;  %v317_v1 = vadd.f32 %v481_v26, %v280_v62  ;;  %v282_v2 = vadd.f32 %v281_v0, %v156_v63  ;;  %v158_v3 = vpop.f32.mrf.mxu0 }
  0xe1   :  { %v283_v4 = vpop.f32.mrf.mxu1 }
  0xe2   :  { %333 = vst [vmem:[%s552_s5 + $0x48] sm:$0xff] %v317_v1  ;;  %v318_v5 = vadd.f32 %v479_v22, %v282_v2  ;;  %v284_v6 = vadd.f32 %v283_v4, %v158_v3  ;;  %v162_v7 = vpop.f32.mrf.mxu0 }
  0xe3   :  { %v287_v8 = vpop.f32.mrf.mxu1 }
  0xe4   :  { %334 = vst [vmem:[%s552_s5 + $0x50] sm:$0xff] %v318_v5  ;;  %v319_v9 = vadd.f32 %v481_v26, %v284_v6  ;;  %v288_v10 = vadd.f32 %v287_v8, %v162_v7  ;;  %v164_v11 = vpop.f32.mrf.mxu0 }
  0xe5   :  { %v289_v12 = vpop.f32.mrf.mxu1 }
  0xe6   :  { %335 = vst [vmem:[%s552_s5 + $0x58] sm:$0xff] %v319_v9  ;;  %v320_v13 = vadd.f32 %v479_v22, %v288_v10  ;;  %v290_v14 = vadd.f32 %v289_v12, %v164_v11  ;;  %v166_v15 = vpop.f32.mrf.mxu0 }
  0xe7   :  { %v291_v16 = vpop.f32.mrf.mxu1 }
  0xe8   :  { %336 = vst [vmem:[%s552_s5 + $0x60] sm:$0xff] %v320_v13  ;;  %v321_v17 = vadd.f32 %v481_v26, %v290_v14  ;;  %v292_v18 = vadd.f32 %v291_v16, %v166_v15  ;;  %v168_v19 = vpop.f32.mrf.mxu0 }
  0xe9   :  { %v293_v20 = vpop.f32.mrf.mxu1 }
  0xea   :  { %337 = vst [vmem:[%s552_s5 + $0x68] sm:$0xff] %v321_v17  ;;  %v322_v21 = vadd.f32 %v479_v22, %v292_v18  ;;  %v294_v23 = vadd.f32 %v293_v20, %v168_v19 }
  0xec   :  { %338 = vst [vmem:[%s552_s5 + $0x70] sm:$0xff] %v322_v21  ;;  %v323_v24 = vadd.f32 %v481_v26, %v294_v23 }
  0xee   :  { %339 = vst [vmem:[%s552_s5 + $0x78] sm:$0xff] %v323_v24 }

// kernel: bilstm_net_forward.5
= control target key start
LH: loop header
LB: loop body
LE: loop exit
PB: predicated region body
PF: predicated region fallthrough
CT: control target
= control target key end

     0   :  { %s710_s15 = smov 0   ;;  %s775_s0 = inlined_call_operand.vmem [shape: f32[8,8,256], index: 0, kind: input, shape index: {}, may-alias: {0,1}]   ;;  %s776_s1 = inlined_call_operand.vmem [shape: f32[8,8,256], index: 1, kind: input, shape index: {}, may-alias: {0,1}]   ;;  %s777_s2 = inlined_call_operand.vmem [shape: bf16[2,32,128], index: 2, kind: input, shape index: {}]   ;;  %s778_s3 = inlined_call_operand.vmem [shape: bf16[8,8,32], index: 3, kind: output, shape index: {0}]   ;;  %s779_s4 = inlined_call_operand.vmem [shape: bf16[8,8,32], index: 4, kind: output, shape index: {1}]  }
   0x1 LB: > { %s582_s16 = sadd.s32 4294967295, %s677_s15   ;;  %p586_p0 = scmp.ge.s32.totalorder %s677_s15, 1  ;;  %s677_s15 = sphi %s710_s15, %s15_s15  }
   0x2   : > { %p182_p1 = scmp.lt.s32.totalorder %s677_s15, 9 }
   0x4   : > { %p183_p2 = pnand %p586_p0, %p182_p1 }
   0x5   : > { %p219_p3 = scmp.lt.s32.totalorder (!%p183_p2), %s582_s16, 7  ;;  %s224_s17 = ssub.s32 (!%p183_p2), 7, %s582_s16 }
   0x6   : > { %186 = sbr.rel (%p183_p2) target bundleno = 731 (0x2db), region = 32  ;;  %p225_p4 = scmp.lt.s32.totalorder (!%p183_p2), %s224_s17, 7 }
   0x7   : > { %p593_p5 = scmp.ne.s32.totalorder (!%p183_p2), %s582_s16, 0 }
   0xb   : > { %s220_s18 = scalar_select %p219_p3, %s582_s16, 7 }
   0xc   : > { %s781_s17 = smov (!%p225_p4, %s224_s17), 7 }
   0xd   : > { %s611_s19 = sshll.u32 %s220_s18, 4  ;;  %s591_s20 = sshll.u32 %s220_s18, 2 }
   0xe   : > { %s721_s23 = scalar_lea.vmem %s775_s0, %s611_s19  ;;  %s612_s24 = sshll.u32 %s781_s17, 4 }
   0xf   : > { %s726_s27 = scalar_lea.vmem %s776_s1, %s612_s24  ;;  %s731_s30 = scalar_lea.vmem %s778_s3, %s591_s20 }
  0x10   : > { %s592_s5 = sshll.u32 %s781_s17, 2  ;;  %246 = sbr.rel (%p593_p5) target bundleno = 24 (0x18), region = 36 }
  0x11   : > { %s736_s8 = scalar_lea.vmem %s779_s4, %s592_s5 }
  0x15   : > { %vm247_vm0 = vcmask 261120   ;;  %v679_v0 = vmov 0.0  }
  0x16   : > { %248 = vst.msk [vmem:[#allocation2] sm:$0xff] %vm247_vm0, %v679_v0  ;;  %249 = vst.msk [vmem:[#allocation2 + $0x8] sm:$0xff] %vm247_vm0, %v679_v0 }
  0x17   : > { %250 = vst.msk [vmem:[#allocation3] sm:$0xff] %vm247_vm0, %v679_v0  ;;  %251 = vst.msk [vmem:[#allocation3 + $0x8] sm:$0xff] %vm247_vm0, %v679_v0 }
  0x18 PF: > { %v651_v1 = vld [vmem:[%s777_s2 + $0x8] sm:$0xff]   ;;  %v680_v2 = vmov 0.0   ;;  %v652_v3 = vld [vmem:[%s777_s2 + $0x18] sm:$0xff]   ;;  %v653_v4 = vld [vmem:[%s777_s2] sm:$0xff]   ;;  %vm681_vm1 = vmmov 0   ;;  %s682_s18 = smov 32  }
  0x19   : > { %621 = vmatprep.subr.bf16.mxu0 %v680_v2  ;;  %629 = vmatprep.subr.bf16.mxu1 %v680_v2  ;;  %v654_v5 = vld [vmem:[%s777_s2 + $0x10] sm:$0xff]   ;;  %vm272_vm2 = vcmask 261120   ;;  %v252_v12 = vld [vmem:[%s721_s23] sm:$0xff]  ;;  %v598_v13 = vld [vmem:[%s726_s27 + $0x8] sm:$0xff]  ;;  %s683_s19 = smov 64   ;;  %s684_s20 = smov 96  }
  0x1a   : > { %622 = vmatpush3.bf16.msra.mxu0 %v651_v1  ;;  %625 = vmatprep.mubr.msk.bf16.mxu0 %vm681_vm1, %v680_v2  ;;  %vm467_vm3 = vcmask 257024  }
  0x1b   : > { %630 = vmatpush3.bf16.msra.mxu1 %v652_v3  ;;  %623 = vmatprep.subr.bf16.mxu0 %v680_v2 }
  0x1c   : > { %631 = vmatprep.subr.bf16.mxu1 %v680_v2  ;;  %633 = vmatprep.mubr.msk.bf16.mxu1 %vm681_vm1, %v680_v2 }
  0x1d   : > { %v253_v6 = vld [vmem:[#allocation2] sm:$0xff]  ;;  %v347_v7 = vld [vmem:[#allocation2 + $0x8] sm:$0xff] }
  0x1e   : > { %v254_v8 = vld [vmem:[#allocation3] sm:$0xff]  ;;  %v259_v9 = vpack.c.bf16 %v253_v6, %v253_v6  ;;  %624 = vmatpush3.bf16.msra.mxu0 %v653_v4  ;;  %v355_v10 = vpack.c.bf16 %v347_v7, %v347_v7  ;;  %v349_v11 = vld [vmem:[#allocation3 + $0x8] sm:$0xff] }
  0x1f   : > { %325 = vrot.lane.b32.xlu1 %v254_v8, %s682_s18  ;;  %632 = vmatpush3.bf16.msra.mxu1 %v654_v5 }
  0x21   : > { %626 = vmatmul.mubr.msk.bf16.vlgmr.msra.gmra.mxu0 %vm272_vm2, %v259_v9 }
  0x22   : > { %634 = vmatmul.mubr.msk.bf16.vlgmr.msra.gmra.mxu1 %vm272_vm2, %v355_v10 }
  0x23   : > { %420 = vrot.lane.b32.xlu1 %v349_v11, %s682_s18 }
  0x91   : > { %v326_v38 = vpop.permute.xlu1 %325 }
  0x95   : > { %v421_v40 = vpop.permute.xlu1 %420 }
  0xe1   : > { %v310_v14 = vpop.f32.mrf.mxu0 }
  0xe2   : > { %v316_v15 = vadd.f32 %v310_v14, %v252_v12  ;;  %v405_v16 = vpop.f32.mrf.mxu1 }
  0xe3   : > { %v411_v17 = vadd.f32 %v598_v13, %v405_v16  ;;  %v627_v18 = vpop.f32.mrf.mxu0 }
  0xe4   : > { %655 = vtanh.f32 %v316_v15  ;;  %v635_v19 = vpop.f32.mrf.mxu1  ;;  %v597_v26 = vmul.f32 -1.442695, %v316_v15 }
  0xe5   : > { %v313_v20 = vpop.f32.mrf.mxu0  ;;  %657 = vtanh.f32 %v411_v17  ;;  %v606_v27 = vmul.f32 -1.442695, %v411_v17 }
  0xe6   : > { %v408_v21 = vpop.f32.mrf.mxu1  ;;  %659 = vpow2.f32 %v597_v26 }
  0xe7   : > { %v628_v22 = vpop.f32.mrf.mxu0  ;;  %661 = vpow2.f32 %v606_v27 }
  0xe8   : > { %v636_v23 = vpop.f32.mrf.mxu1 }
  0xf1   : > { %v656_v24 = vpop.eup %655 }
  0xf2   : > { %330 = vrot.lane.b32.xlu0 %v656_v24, %s683_s19  ;;  %v658_v25 = vpop.eup %657 }
  0xf3   : > { %v660_v28 = vpop.eup %659 }
  0xf4   : > { %v320_v29 = vadd.f32 1.0, %v660_v28  ;;  %v662_v30 = vpop.eup %661 }
  0xf5   : > { %v415_v31 = vadd.f32 1.0, %v662_v30 }
  0xf6   : > { %425 = vrot.lane.b32.xlu0 %v658_v25, %s683_s19  ;;  %663 = vrcp.f32 %v320_v29 }
  0xf7   : > { %665 = vrcp.f32 %v415_v31 }
 0x103   : > { %v664_v32 = vpop.eup %663 }
 0x104   : > { %v666_v35 = vpop.eup %665  ;;  %v328_v39 = vmul.f32 %v664_v32, %v326_v38 }
 0x105   : > { %v423_v43 = vmul.f32 %v666_v35, %v421_v40 }
 0x164   : > { %v331_v33 = vpop.permute.xlu0 %330 }
 0x165   : > { %v333_v34 = vmul.f32 %v664_v32, %v331_v33 }
 0x167   : > { %335 = vrot.lane.b32.xlu0 %v333_v34, %s682_s18 }
 0x168   : > { %v426_v36 = vpop.permute.xlu0 %425 }
 0x169   : > { %v428_v37 = vmul.f32 %v666_v35, %v426_v36 }
 0x16b   : > { %430 = vrot.lane.b32.xlu1 %v428_v37, %s682_s18 }
 0x1d9   : > { %v336_v41 = vpop.permute.xlu0 %335 }
 0x1da   : > { %v338_v42 = vadd.f32 %v336_v41, %v328_v39 }
 0x1dc   : > { %667 = vtanh.f32 %v338_v42 }
 0x1dd   : > { %v431_v44 = vpop.permute.xlu1 %430 }
 0x1de   : > { %v433_v45 = vadd.f32 %v431_v44, %v423_v43 }
 0x1e0   : > { %669 = vtanh.f32 %v433_v45 }
 0x1e9   : > { %v668_v46 = vpop.eup %667 }
 0x1ea   : > { %341 = vrot.lane.b32.xlu0 %v668_v46, %s683_s19 }
 0x1ed   : > { %v670_v47 = vpop.eup %669 }
 0x1ee   : > { %436 = vrot.lane.b32.xlu1 %v670_v47, %s683_s19 }
 0x1f2   : > { %446 = vrot.lane.b32.xlu1 %v338_v42, %s684_s20 }
 0x1f6   : > { %456 = vrot.lane.b32.xlu1 %v433_v45, %s684_s20 }
 0x25c   : > { %v342_v48 = vpop.permute.xlu0 %341 }
 0x25d   : > { %v344_v49 = vmul.f32 %v664_v32, %v342_v48 }
 0x25f   : > { %441 = vrot.lane.b32.xlu0 %v344_v49, %s682_s18  ;;  %v613_v54 = vpack.c.bf16 %v344_v49, %v344_v49 }
 0x260   : > { %v437_v50 = vpop.permute.xlu1 %436 }
 0x261   : > { %v439_v51 = vmul.f32 %v666_v35, %v437_v50 }
 0x263   : > { %v614_v52 = vpack.c.bf16 %v439_v51, %v439_v51  ;;  %451 = vrot.lane.b32.xlu0 %v439_v51, %s682_s18 }
 0x264   : > { %v447_v53 = vpop.permute.xlu1 %446 }
 0x265   : > { %449 = vst.msk [vmem:[#allocation3] sm:$0xff] %vm272_vm2, %v447_v53  ;;  %473 = vrot.lane.b32.xlu1 %v614_v52, %s682_s18 }
 0x267   : > { %464 = vrot.lane.b32.xlu0 %v613_v54, %s682_s18 }
 0x268   : > { %v457_v55 = vpop.permute.xlu1 %456 }
 0x269   : > { %459 = vst.msk [vmem:[#allocation3 + $0x8] sm:$0xff] %vm272_vm2, %v457_v55 }
 0x2d1   : > { %v442_v56 = vpop.permute.xlu0 %441 }
 0x2d2   : > { %444 = vst.msk [vmem:[#allocation2] sm:$0xff] %vm272_vm2, %v442_v56 }
 0x2d5   : > { %v452_v57 = vpop.permute.xlu0 %451 }
 0x2d6   : > { %454 = vst.msk [vmem:[#allocation2 + $0x8] sm:$0xff] %vm272_vm2, %v452_v57 }
 0x2d7   : > { %v474_v58 = vpop.permute.xlu1 %473 }
 0x2d8   : > { %476 = vst.msk [vmem:[%s736_s8] sm:$0xf] %vm467_vm3, %v474_v58 }
 0x2d9   : > { %v465_v59 = vpop.permute.xlu0 %464 }
 0x2da   : > { %468 = vst.msk [vmem:[%s731_s30] sm:$0xf] %vm467_vm3, %v465_v59 }
 0x2db PF: > { %s15_s15 = sadd.s32 1, %s677_s15  }
 0x2dc   : > { %p12_p6 = scmp.ge.s32.totalorder %s15_s15, 10  }
 0x2de   :  { %14 = sbr.rel (!%p12_p6) target bundleno = 1 (0x1), region = 84 }

// kernel: bilstm_net_forward.7
= control target key start
LH: loop header
LB: loop body
LE: loop exit
PB: predicated region body
PF: predicated region fallthrough
CT: control target
= control target key end

     0   :  { %s853_s18 = smov 0   ;;  %s953_s0 = inlined_call_operand.vmem [shape: f32[8,8,256], index: 0, kind: input, shape index: {}, may-alias: {0,1}]   ;;  %s954_s1 = inlined_call_operand.vmem [shape: f32[8,8,256], index: 1, kind: input, shape index: {}, may-alias: {0,1}]   ;;  %s955_s2 = inlined_call_operand.vmem [shape: bf16[2,32,128], index: 2, kind: input, shape index: {}]   ;;  %s956_s3 = inlined_call_operand.vmem [shape: f32[2,32,4], index: 3, kind: input, shape index: {}]   ;;  %s957_s4 = inlined_call_operand.vmem [shape: f32[1,4], index: 4, kind: input, shape index: {}]   ;;  %s958_s5 = inlined_call_operand.vmem [shape: f32[8,4], index: 5, kind: output, shape index: {}]  }
   0x1 LB: > { %s859_s19 = sadd.s32 4294967295, %s811_s18   ;;  %p681_p0 = scmp.ge.s32.totalorder %s811_s18, 1  ;;  %s811_s18 = sphi %s853_s18, %s15_s18  }
   0x2   : > { %p197_p1 = scmp.lt.s32.totalorder %s811_s18, 9 }
   0x4   : > { %p198_p2 = pnand %p681_p0, %p197_p1 }
   0x5   : > { %p227_p3 = scmp.lt.s32.totalorder (!%p198_p2), %s859_s19, 7  ;;  %s232_s20 = ssub.s32 (!%p198_p2), 7, %s859_s19 }
   0x6   : > { %201 = sbr.rel (%p198_p2) target bundleno = 1140 (0x474), region = 40  ;;  %p233_p4 = scmp.lt.s32.totalorder (!%p198_p2), %s232_s20, 7 }
   0x7   : > { %p686_p5 = scmp.ne.s32.totalorder (!%p198_p2), %s859_s19, 0 }
   0xb   : > { %s228_s21 = scalar_select %p227_p3, %s859_s19, 7 }
   0xc   : > { %s960_s20 = smov (!%p233_p4, %s232_s20), 7  ;;  %244 = sbr.rel (%p686_p5) target bundleno = 20 (0x14), region = 44 }
   0xd   : > { %s711_s22 = sshll.u32 %s228_s21, 4  ;;  %s712_s26 = sshll.u32 %s960_s20, 4 }
   0xe   : > { %s869_s25 = scalar_lea.vmem %s953_s0, %s711_s22  ;;  %s874_s29 = scalar_lea.vmem %s954_s1, %s712_s26 }
  0x11   : > { %vm245_vm0 = vcmask 261120   ;;  %v813_v0 = vmov 0.0  }
  0x12   : > { %246 = vst.msk [vmem:[#allocation2] sm:$0xff] %vm245_vm0, %v813_v0  ;;  %247 = vst.msk [vmem:[#allocation2 + $0x8] sm:$0xff] %vm245_vm0, %v813_v0 }
  0x13   : > { %248 = vst.msk [vmem:[#allocation3] sm:$0xff] %vm245_vm0, %v813_v0  ;;  %249 = vst.msk [vmem:[#allocation3 + $0x8] sm:$0xff] %vm245_vm0, %v813_v0 }
  0x14 PF: > { %v785_v1 = vld [vmem:[%s955_s2 + $0x8] sm:$0xff]   ;;  %v814_v2 = vmov 0.0   ;;  %v786_v3 = vld [vmem:[%s955_s2 + $0x18] sm:$0xff]   ;;  %v787_v4 = vld [vmem:[%s955_s2] sm:$0xff]   ;;  %vm815_vm1 = vmmov 0   ;;  %s816_s13 = smov 32  }
  0x15   : > { %729 = vmatprep.subr.bf16.mxu0 %v814_v2  ;;  %737 = vmatprep.subr.bf16.mxu1 %v814_v2  ;;  %v788_v5 = vld [vmem:[%s955_s2 + $0x10] sm:$0xff]   ;;  %vm270_vm2 = vcmask 261120   ;;  %v250_v12 = vld [vmem:[%s869_s25] sm:$0xff]  ;;  %v691_v13 = vld [vmem:[%s874_s29 + $0x8] sm:$0xff]  ;;  %s817_s14 = smov 64   ;;  %s818_s15 = smov 96  }
  0x16   : > { %730 = vmatpush3.bf16.msra.mxu0 %v785_v1  ;;  %733 = vmatprep.mubr.msk.bf16.mxu0 %vm815_vm1, %v814_v2 }
  0x17   : > { %738 = vmatpush3.bf16.msra.mxu1 %v786_v3  ;;  %731 = vmatprep.subr.bf16.mxu0 %v814_v2 }
  0x18   : > { %739 = vmatprep.subr.bf16.mxu1 %v814_v2  ;;  %741 = vmatprep.mubr.msk.bf16.mxu1 %vm815_vm1, %v814_v2 }
  0x19   : > { %v251_v6 = vld [vmem:[#allocation2] sm:$0xff]  ;;  %v345_v7 = vld [vmem:[#allocation2 + $0x8] sm:$0xff] }
  0x1a   : > { %v252_v8 = vld [vmem:[#allocation3] sm:$0xff]  ;;  %v257_v9 = vpack.c.bf16 %v251_v6, %v251_v6  ;;  %732 = vmatpush3.bf16.msra.mxu0 %v787_v4  ;;  %v353_v10 = vpack.c.bf16 %v345_v7, %v345_v7  ;;  %v347_v11 = vld [vmem:[#allocation3 + $0x8] sm:$0xff] }
  0x1b   : > { %323 = vrot.lane.b32.xlu1 %v252_v8, %s816_s13  ;;  %740 = vmatpush3.bf16.msra.mxu1 %v788_v5 }
  0x1d   : > { %734 = vmatmul.mubr.msk.bf16.vlgmr.msra.gmra.mxu0 %vm270_vm2, %v257_v9 }
  0x1e   : > { %742 = vmatmul.mubr.msk.bf16.vlgmr.msra.gmra.mxu1 %vm270_vm2, %v353_v10 }
  0x1f   : > { %418 = vrot.lane.b32.xlu1 %v347_v11, %s816_s13 }
  0x8d   : > { %v324_v38 = vpop.permute.xlu1 %323 }
  0x91   : > { %v419_v40 = vpop.permute.xlu1 %418 }
  0xdd   : > { %v308_v14 = vpop.f32.mrf.mxu0 }
  0xde   : > { %v314_v15 = vadd.f32 %v308_v14, %v250_v12  ;;  %v403_v16 = vpop.f32.mrf.mxu1 }
  0xdf   : > { %v409_v17 = vadd.f32 %v691_v13, %v403_v16  ;;  %v735_v18 = vpop.f32.mrf.mxu0 }
  0xe0   : > { %789 = vtanh.f32 %v314_v15  ;;  %v743_v19 = vpop.f32.mrf.mxu1  ;;  %v690_v26 = vmul.f32 -1.442695, %v314_v15 }
  0xe1   : > { %v311_v20 = vpop.f32.mrf.mxu0  ;;  %791 = vtanh.f32 %v409_v17  ;;  %v699_v27 = vmul.f32 -1.442695, %v409_v17 }
  0xe2   : > { %v406_v21 = vpop.f32.mrf.mxu1  ;;  %793 = vpow2.f32 %v690_v26 }
  0xe3   : > { %v736_v22 = vpop.f32.mrf.mxu0  ;;  %795 = vpow2.f32 %v699_v27 }
  0xe4   : > { %v744_v23 = vpop.f32.mrf.mxu1 }
  0xed   : > { %v790_v24 = vpop.eup %789 }
  0xee   : > { %328 = vrot.lane.b32.xlu0 %v790_v24, %s817_s14  ;;  %v792_v25 = vpop.eup %791 }
  0xef   : > { %v794_v28 = vpop.eup %793 }
  0xf0   : > { %v318_v29 = vadd.f32 1.0, %v794_v28  ;;  %v796_v30 = vpop.eup %795 }
  0xf1   : > { %v413_v31 = vadd.f32 1.0, %v796_v30 }
  0xf2   : > { %423 = vrot.lane.b32.xlu0 %v792_v25, %s817_s14  ;;  %797 = vrcp.f32 %v318_v29 }
  0xf3   : > { %799 = vrcp.f32 %v413_v31 }
  0xff   : > { %v798_v32 = vpop.eup %797 }
 0x100   : > { %v800_v35 = vpop.eup %799  ;;  %v326_v39 = vmul.f32 %v798_v32, %v324_v38 }
 0x101   : > { %v421_v43 = vmul.f32 %v800_v35, %v419_v40 }
 0x160   : > { %v329_v33 = vpop.permute.xlu0 %328 }
 0x161   : > { %v331_v34 = vmul.f32 %v798_v32, %v329_v33 }
 0x163   : > { %333 = vrot.lane.b32.xlu0 %v331_v34, %s816_s13 }
 0x164   : > { %v424_v36 = vpop.permute.xlu0 %423 }
 0x165   : > { %v426_v37 = vmul.f32 %v800_v35, %v424_v36 }
 0x167   : > { %428 = vrot.lane.b32.xlu1 %v426_v37, %s816_s13 }
 0x1d5   : > { %v334_v41 = vpop.permute.xlu0 %333 }
 0x1d6   : > { %v336_v42 = vadd.f32 %v334_v41, %v326_v39 }
 0x1d8   : > { %801 = vtanh.f32 %v336_v42 }
 0x1d9   : > { %v429_v44 = vpop.permute.xlu1 %428 }
 0x1da   : > { %v431_v45 = vadd.f32 %v429_v44, %v421_v43 }
 0x1dc   : > { %803 = vtanh.f32 %v431_v45 }
 0x1e5   : > { %v802_v46 = vpop.eup %801 }
 0x1e6   : > { %339 = vrot.lane.b32.xlu0 %v802_v46, %s817_s14 }
 0x1e9   : > { %v804_v47 = vpop.eup %803 }
 0x1ea   : > { %434 = vrot.lane.b32.xlu1 %v804_v47, %s817_s14 }
 0x1ee   : > { %444 = vrot.lane.b32.xlu1 %v336_v42, %s818_s15 }
 0x1f2   : > { %454 = vrot.lane.b32.xlu1 %v431_v45, %s818_s15 }
 0x258   : > { %v340_v48 = vpop.permute.xlu0 %339 }
 0x259   : > { %v342_v49 = vmul.f32 %v798_v32, %v340_v48 }
 0x25b   : > { %439 = vrot.lane.b32.xlu0 %v342_v49, %s816_s13 }
 0x25c   : > { %v435_v50 = vpop.permute.xlu1 %434 }
 0x25d   : > { %v437_v51 = vmul.f32 %v800_v35, %v435_v50 }
 0x25f   : > { %449 = vrot.lane.b32.xlu0 %v437_v51, %s816_s13 }
 0x260   : > { %v445_v52 = vpop.permute.xlu1 %444 }
 0x261   : > { %447 = vst.msk [vmem:[#allocation3] sm:$0xff] %vm270_vm2, %v445_v52 }
 0x264   : > { %v455_v53 = vpop.permute.xlu1 %454 }
 0x265   : > { %457 = vst.msk [vmem:[#allocation3 + $0x8] sm:$0xff] %vm270_vm2, %v455_v53 }
 0x2cd   : > { %v440_v54 = vpop.permute.xlu0 %439 }
 0x2ce   : > { %442 = vst.msk [vmem:[#allocation2] sm:$0xff] %vm270_vm2, %v440_v54  ;;  %460 = sbr.rel (%p686_p5) target bundleno = 928 (0x3a0), region = 48 }
 0x2d1   : > { %v450_v55 = vpop.permute.xlu0 %449 }
 0x2d2   : > { %452 = vst.msk [vmem:[#allocation2 + $0x8] sm:$0xff] %vm270_vm2, %v450_v55 }
 0x2d3   : > { %v704_v56 = vld [vmem:[%s956_s3 + $0x38] sm:$0xff]  ;;  %v819_v57 = vmov 0.0   ;;  %v703_v58 = vld [vmem:[%s956_s3 + $0x30] sm:$0xff]  ;;  %vm820_vm3 = vmmov 0   ;;  %v702_v59 = vld [vmem:[%s956_s3 + $0x28] sm:$0xff]  ;;  %vm546_vm4 = vcmask 31744  }
 0x2d4   : > { %745 = vmatprep.subr.mxu0 %v819_v57  ;;  %753 = vmatprep.mubr.msk.f32.mxu0 %vm820_vm3, %v819_v57  ;;  %v701_v60 = vld [vmem:[%s956_s3 + $0x20] sm:$0xff] }
 0x2d5   : > { %746 = vmatpush3.msra.mxu0 %v704_v56  ;;  %v706_v61 = vld [vmem:[%s957_s4] ss:$0 sm:$0xff] }
 0x2d6   : > { %747 = vmatprep.subr.mxu0 %v819_v57 }
 0x2d7   : > { %748 = vmatpush3.msra.mxu0 %v703_v58 }
 0x2d8   : > { %749 = vmatprep.subr.mxu0 %v819_v57 }
 0x2d9   : > { %750 = vmatpush3.msra.mxu0 %v702_v59 }
 0x2da   : > { %751 = vmatprep.subr.mxu0 %v819_v57 }
 0x2db   : > { %752 = vmatpush3.msra.mxu0 %v701_v60 }
 0x2dc   : > { %754 = vmatmul.mubr.msk.f32.vlgmr.msra.gmra.mxu0 %vm270_vm2, %v450_v55 }
 0x39c   : > { %v535_v62 = vpop.f32.mrf.mxu0 }
 0x39d   : > { %v545_v63 = vadd.f32 %v706_v61, %v535_v62 }
 0x39e   : > { %v755_v0 = vpop.f32.mrf.mxu0 }
 0x39f   : > { %547 = vst.msk [vmem:[%s958_s5] sm:$0xff] %vm546_vm4, %v545_v63 }
 0x3a0 PF: > { %p707_p6 = scmp.ne.s32.totalorder %s859_s19, 7 }
 0x3a2   : > { %551 = sbr.rel (%p707_p6) target bundleno = 1140 (0x474), region = 52 }
 0x3a7   : > { %v556_v1 = vld [vmem:[%s956_s3 + $0x18] sm:$0xff]  ;;  %v821_v2 = vmov 0.0   ;;  %v555_v3 = vld [vmem:[%s956_s3 + $0x10] sm:$0xff]  ;;  %vm822_vm5 = vmmov 0   ;;  %v554_v4 = vld [vmem:[%s956_s3 + $0x8] sm:$0xff]  ;;  %vm630_vm6 = vcmask 31744  }
 0x3a8   : > { %756 = vmatprep.subr.mxu0 %v821_v2  ;;  %764 = vmatprep.mubr.msk.f32.mxu0 %vm822_vm5, %v821_v2  ;;  %v553_v5 = vld [vmem:[%s956_s3] sm:$0xff] }
 0x3a9   : > { %757 = vmatpush3.msra.mxu0 %v556_v1  ;;  %v552_v6 = vld [vmem:[%s958_s5] sm:$0xff] }
 0x3aa   : > { %758 = vmatprep.subr.mxu0 %v821_v2 }
 0x3ab   : > { %759 = vmatpush3.msra.mxu0 %v555_v3 }
 0x3ac   : > { %760 = vmatprep.subr.mxu0 %v821_v2 }
 0x3ad   : > { %761 = vmatpush3.msra.mxu0 %v554_v4 }
 0x3ae   : > { %762 = vmatprep.subr.mxu0 %v821_v2 }
 0x3af   : > { %763 = vmatpush3.msra.mxu0 %v553_v5 }
 0x3b0   : > { %765 = vmatmul.mubr.msk.f32.vlgmr.msra.gmra.mxu0 %vm270_vm2, %v440_v54 }
 0x470   : > { %v625_v7 = vpop.f32.mrf.mxu0 }
 0x471   : > { %v629_v8 = vadd.f32 %v625_v7, %v552_v6 }
 0x472   : > { %v766_v9 = vpop.f32.mrf.mxu0 }
 0x473   : > { %631 = vst.msk [vmem:[%s958_s5] sm:$0xff] %vm630_vm6, %v629_v8 }
 0x474 PF: > { %s15_s18 = sadd.s32 1, %s811_s18  }
 0x475   : > { %p12_p7 = scmp.ge.s32.totalorder %s15_s18, 10  }
 0x477   :  { %14 = sbr.rel (!%p12_p7) target bundleno = 1 (0x1), region = 85 }

</bundles_post_ra>
